<compile_context>
chip_gen: v5e
topology: v5e:2x2
jax: 0.10.0
libtpu: 0.0.40
codegen_flags: <defaults>
</compile_context>

<pallas_src>
import jax
import jax.numpy as jnp
import numpy as np
from jax.experimental import pallas as pl
from jax.experimental.pallas import tpu as pltpu

KS = 5          # kernel_size
PAD = KS // 2   # padding
INHIB = 0.3     # inhibition_strength


def make_dog_weight(channels, kernel_size=KS, inhibition_strength=INHIB):
    """Deterministic DoG kernel, identical to LateralInhibition.init_dog_kernel."""
    center_sigma = kernel_size / 6.0
    surround_sigma = kernel_size / 3.0
    grid = np.linspace(-(kernel_size // 2), kernel_size // 2, kernel_size,
                       dtype=np.float32)
    xg, yg = np.meshgrid(grid, grid, indexing="ij")
    dist = xg ** 2 + yg ** 2
    center = np.exp(-dist / (2.0 * center_sigma ** 2))
    surround = np.exp(-dist / (2.0 * surround_sigma ** 2))
    dog = center - inhibition_strength * surround
    dog = dog / np.abs(dog).sum()
    # depthwise weight: (C, KS, KS) (PyTorch stores (C, 1, KS, KS)); all
    # channels share the same DoG by construction.
    w = np.broadcast_to(dog, (channels, kernel_size, kernel_size)).copy()
    return jnp.asarray(w, dtype=jnp.float32)


def _lateral_inhibition_kernel(taps_ref, x_ref, o_ref, pad_ref):
    # taps_ref : SMEM (KS*KS,) f32  -- alpha * DoG taps (shared across channels)
    # x_ref    : VMEM (1, Cb, H, W) input block
    # o_ref    : VMEM (1, Cb, H, W) output block
    # pad_ref  : VMEM (Cb, H+2P, W+2P) scratch (zero-padded plane, built here)
    Cb = o_ref.shape[1]
    H = o_ref.shape[2]
    W = o_ref.shape[3]

    # Build the zero-padded plane entirely in VMEM (no HBM pad pre-pass).
    # Zero every step so correctness never depends on scratch state or on how
    # the parallel grid is sharded across TensorCores.
    pad_ref[...] = jnp.zeros_like(pad_ref)
    pad_ref[:, PAD:PAD + H, PAD:PAD + W] = x_ref[0]

    # 5x5 depthwise conv as 25 shifted multiply-accumulates (static unroll).
    # Taps already include alpha, so out = x + sum(tap_ij * shift_ij(x)).
    # (f32 accumulate; a bf16 tap-accumulate is a possible v6e/v7x follow-up.)
    acc = jnp.zeros((Cb, H, W), jnp.float32)
    for di in range(KS):
        for dj in range(KS):
            acc = acc + taps_ref[di * KS + dj] * pad_ref[:, di:di + H, dj:dj + W]

    # Residual from the same (single) input block.
    o_ref[0] = (x_ref[0] + acc).astype(o_ref.dtype)


def _pick_cb(N, C, H, W, budget_bytes=2 << 20):
    """Largest channel-block Cb dividing C with roughly <= budget_bytes live."""
    hp, wp = H + 2 * PAD, W + 2 * PAD
    # per-channel f32 bytes: padded scratch + double-buffered in/out blocks.
    per_c = (hp * wp + 4 * H * W) * 4
    cb = int(max(1, min(C, budget_bytes // max(per_c, 1))))
    while C % cb:
        cb -= 1
    # keep >= 2 grid steps on the parallel axes (v7x has 2 TensorCores).
    while N * (C // cb) < 2 and cb > 1:
        cb -= 1
        while C % cb:
            cb -= 1
    return cb


@jax.jit
def lateral_inhibition(x, weight, alpha):
    """x: (N, C, H, W) f32; weight: (C, KS, KS) shared DoG; alpha: (1,) f32."""
    N, C, H, W = x.shape
    Cb = _pick_cb(N, C, H, W)

    # The module's depthwise weight is the same DoG for every channel, so fold
    # alpha into a single (KS*KS,) tap vector.
    # (Per-channel trained depthwise weights would need a per-channel tap path.)
    taps = (alpha[0] * weight[0]).reshape(KS * KS)

    return pl.pallas_call(
        _lateral_inhibition_kernel,
        out_shape=jax.ShapeDtypeStruct((N, C, H, W), x.dtype),
        grid=(N, C // Cb),
        in_specs=[
            pl.BlockSpec(memory_space=pltpu.MemorySpace.SMEM),        # taps
            pl.BlockSpec((1, Cb, H, W), lambda n, c: (n, c, 0, 0)),   # x
        ],
        out_specs=pl.BlockSpec((1, Cb, H, W), lambda n, c: (n, c, 0, 0)),
        scratch_shapes=[pltpu.VMEM((Cb, H + 2 * PAD, W + 2 * PAD), jnp.float32)],
        compiler_params=pltpu.CompilerParams(
            dimension_semantics=("parallel", "parallel")),
    )(taps, x)


def _reference(x, weight, alpha):
    """Plain-JAX depthwise conv reference for correctness check."""
    C = x.shape[1]
    w = weight[:, None, :, :]   # (O=C, I=1, KS, KS), feature_group_count=C
    inhib = jax.lax.conv_general_dilated(
        x, w, window_strides=(1, 1), padding=((PAD, PAD), (PAD, PAD)),
        dimension_numbers=("NCHW", "OIHW", "NCHW"), feature_group_count=C)
    return x + alpha[0] * inhib


if __name__ == "__main__":
    N, C, H, W = 2, 4, 16, 16

    key = jax.random.PRNGKey(0)
    x = jax.random.normal(key, (N, C, H, W), dtype=jnp.float32)

    weight = make_dog_weight(C)                      # deterministic DoG init
    alpha = jnp.ones((1,), dtype=jnp.float32)        # nn.Parameter(torch.ones(1))

    out = jax.block_until_ready(lateral_inhibition(x, weight, alpha))

    ref = _reference(x, weight, alpha)
    np.testing.assert_allclose(np.asarray(out), np.asarray(ref),
                               rtol=1e-5, atol=1e-5)

    print("KERNEL_OK")
</pallas_src>

<mosaic_0001>
module attributes {stable_mosaic.version = 11 : i64} {
  func.func @_lateral_inhibition_kernel(%arg0: i32, %arg1: i32, %arg2: memref<25xf32, #tpu.memory_space<smem>>, %arg3: memref<1x4x16x16xf32, #tpu.memory_space<vmem>>, %arg4: memref<1x4x16x16xf32, #tpu.memory_space<vmem>>, %arg5: memref<4x20x20xf32, #tpu.memory_space<vmem>>) attributes {dimension_semantics = [#tpu.dimension_semantics<parallel>, #tpu.dimension_semantics<parallel>], iteration_bounds = array<i64: 2, 1>, scalar_prefetch = 0 : i64, scratch_operands = 1 : i64, tpu.core_type = #tpu.core_type<tc>, window_params = [{transform_indices = @transform_0, window_bounds = array<i64: 25>}, {transform_indices = @transform_1, window_bounds = array<i64: 1, 4, 16, 16>}, {transform_indices = @transform_2, window_bounds = array<i64: 1, 4, 16, 16>}]} {
    %cst = arith.constant 0.000000e+00 : f32
    %0 = vector.broadcast %cst : f32 to vector<4x20x20xf32>
    %c0 = arith.constant 0 : index
    %c0_0 = arith.constant 0 : index
    %c0_1 = arith.constant 0 : index
    %1 = vector.load %arg5[%c0, %c0_0, %c0_1] : memref<4x20x20xf32, #tpu.memory_space<vmem>>, vector<4x20x20xf32>
    tpu.vector_store %arg5[%c0, %c0_0, %c0_1], %0 {strides = array<i32>} : memref<4x20x20xf32, #tpu.memory_space<vmem>>, vector<4x20x20xf32>,
    %c0_2 = arith.constant 0 : index
    %c0_3 = arith.constant 0 : index
    %c0_4 = arith.constant 0 : index
    %c0_5 = arith.constant 0 : index
    %2 = vector.load %arg3[%c0_2, %c0_3, %c0_4, %c0_5] : memref<1x4x16x16xf32, #tpu.memory_space<vmem>>, vector<1x4x16x16xf32>
    %3 = vector.shape_cast %2 : vector<1x4x16x16xf32> to vector<4x16x16xf32>
    %c0_6 = arith.constant 0 : index
    %c2 = arith.constant 2 : index
    %c2_7 = arith.constant 2 : index
    %4 = vector.load %arg5[%c0_6, %c2, %c2_7] : memref<4x20x20xf32, #tpu.memory_space<vmem>>, vector<4x16x16xf32>
    tpu.vector_store %arg5[%c0_6, %c2, %c2_7], %3 {strides = array<i32>} : memref<4x20x20xf32, #tpu.memory_space<vmem>>, vector<4x16x16xf32>,
    %cst_8 = arith.constant 0.000000e+00 : f32
    %5 = vector.broadcast %cst_8 : f32 to vector<4x16x16xf32>
    %c0_9 = arith.constant 0 : index
    %6 = memref.load %arg2[%c0_9] : memref<25xf32, #tpu.memory_space<smem>>
    %c0_10 = arith.constant 0 : index
    %c0_11 = arith.constant 0 : index
    %c0_12 = arith.constant 0 : index
    %7 = vector.load %arg5[%c0_10, %c0_11, %c0_12] : memref<4x20x20xf32, #tpu.memory_space<vmem>>, vector<4x16x16xf32>
    %8 = vector.broadcast %6 : f32 to vector<4x16x16xf32>
    %9 = arith.mulf %8, %7 : vector<4x16x16xf32>
    %10 = arith.addf %5, %9 : vector<4x16x16xf32>
    %c1 = arith.constant 1 : index
    %11 = memref.load %arg2[%c1] : memref<25xf32, #tpu.memory_space<smem>>
    %c0_13 = arith.constant 0 : index
    %c0_14 = arith.constant 0 : index
    %c1_15 = arith.constant 1 : index
    %12 = vector.load %arg5[%c0_13, %c0_14, %c1_15] : memref<4x20x20xf32, #tpu.memory_space<vmem>>, vector<4x16x16xf32>
    %13 = vector.broadcast %11 : f32 to vector<4x16x16xf32>
    %14 = arith.mulf %13, %12 : vector<4x16x16xf32>
    %15 = arith.addf %10, %14 : vector<4x16x16xf32>
    %c2_16 = arith.constant 2 : index
    %16 = memref.load %arg2[%c2_16] : memref<25xf32, #tpu.memory_space<smem>>
    %c0_17 = arith.constant 0 : index
    %c0_18 = arith.constant 0 : index
    %c2_19 = arith.constant 2 : index
    %17 = vector.load %arg5[%c0_17, %c0_18, %c2_19] : memref<4x20x20xf32, #tpu.memory_space<vmem>>, vector<4x16x16xf32>
    %18 = vector.broadcast %16 : f32 to vector<4x16x16xf32>
    %19 = arith.mulf %18, %17 : vector<4x16x16xf32>
    %20 = arith.addf %15, %19 : vector<4x16x16xf32>
    %c3 = arith.constant 3 : index
    %21 = memref.load %arg2[%c3] : memref<25xf32, #tpu.memory_space<smem>>
    %c0_20 = arith.constant 0 : index
    %c0_21 = arith.constant 0 : index
    %c3_22 = arith.constant 3 : index
    %22 = vector.load %arg5[%c0_20, %c0_21, %c3_22] : memref<4x20x20xf32, #tpu.memory_space<vmem>>, vector<4x16x16xf32>
    %23 = vector.broadcast %21 : f32 to vector<4x16x16xf32>
    %24 = arith.mulf %23, %22 : vector<4x16x16xf32>
    %25 = arith.addf %20, %24 : vector<4x16x16xf32>
    %c4 = arith.constant 4 : index
    %26 = memref.load %arg2[%c4] : memref<25xf32, #tpu.memory_space<smem>>
    %c0_23 = arith.constant 0 : index
    %c0_24 = arith.constant 0 : index
    %c4_25 = arith.constant 4 : index
    %27 = vector.load %arg5[%c0_23, %c0_24, %c4_25] : memref<4x20x20xf32, #tpu.memory_space<vmem>>, vector<4x16x16xf32>
    %28 = vector.broadcast %26 : f32 to vector<4x16x16xf32>
    %29 = arith.mulf %28, %27 : vector<4x16x16xf32>
    %30 = arith.addf %25, %29 : vector<4x16x16xf32>
    %c5 = arith.constant 5 : index
    %31 = memref.load %arg2[%c5] : memref<25xf32, #tpu.memory_space<smem>>
    %c0_26 = arith.constant 0 : index
    %c1_27 = arith.constant 1 : index
    %c0_28 = arith.constant 0 : index
    %32 = vector.load %arg5[%c0_26, %c1_27, %c0_28] : memref<4x20x20xf32, #tpu.memory_space<vmem>>, vector<4x16x16xf32>
    %33 = vector.broadcast %31 : f32 to vector<4x16x16xf32>
    %34 = arith.mulf %33, %32 : vector<4x16x16xf32>
    %35 = arith.addf %30, %34 : vector<4x16x16xf32>
    %c6 = arith.constant 6 : index
    %36 = memref.load %arg2[%c6] : memref<25xf32, #tpu.memory_space<smem>>
    %c0_29 = arith.constant 0 : index
    %c1_30 = arith.constant 1 : index
    %c1_31 = arith.constant 1 : index
    %37 = vector.load %arg5[%c0_29, %c1_30, %c1_31] : memref<4x20x20xf32, #tpu.memory_space<vmem>>, vector<4x16x16xf32>
    %38 = vector.broadcast %36 : f32 to vector<4x16x16xf32>
    %39 = arith.mulf %38, %37 : vector<4x16x16xf32>
    %40 = arith.addf %35, %39 : vector<4x16x16xf32>
    %c7 = arith.constant 7 : index
    %41 = memref.load %arg2[%c7] : memref<25xf32, #tpu.memory_space<smem>>
    %c0_32 = arith.constant 0 : index
    %c1_33 = arith.constant 1 : index
    %c2_34 = arith.constant 2 : index
    %42 = vector.load %arg5[%c0_32, %c1_33, %c2_34] : memref<4x20x20xf32, #tpu.memory_space<vmem>>, vector<4x16x16xf32>
    %43 = vector.broadcast %41 : f32 to vector<4x16x16xf32>
    %44 = arith.mulf %43, %42 : vector<4x16x16xf32>
    %45 = arith.addf %40, %44 : vector<4x16x16xf32>
    %c8 = arith.constant 8 : index
    %46 = memref.load %arg2[%c8] : memref<25xf32, #tpu.memory_space<smem>>
    %c0_35 = arith.constant 0 : index
    %c1_36 = arith.constant 1 : index
    %c3_37 = arith.constant 3 : index
    %47 = vector.load %arg5[%c0_35, %c1_36, %c3_37] : memref<4x20x20xf32, #tpu.memory_space<vmem>>, vector<4x16x16xf32>
    %48 = vector.broadcast %46 : f32 to vector<4x16x16xf32>
    %49 = arith.mulf %48, %47 : vector<4x16x16xf32>
    %50 = arith.addf %45, %49 : vector<4x16x16xf32>
    %c9 = arith.constant 9 : index
    %51 = memref.load %arg2[%c9] : memref<25xf32, #tpu.memory_space<smem>>
    %c0_38 = arith.constant 0 : index
    %c1_39 = arith.constant 1 : index
    %c4_40 = arith.constant 4 : index
    %52 = vector.load %arg5[%c0_38, %c1_39, %c4_40] : memref<4x20x20xf32, #tpu.memory_space<vmem>>, vector<4x16x16xf32>
    %53 = vector.broadcast %51 : f32 to vector<4x16x16xf32>
    %54 = arith.mulf %53, %52 : vector<4x16x16xf32>
    %55 = arith.addf %50, %54 : vector<4x16x16xf32>
    %c10 = arith.constant 10 : index
    %56 = memref.load %arg2[%c10] : memref<25xf32, #tpu.memory_space<smem>>
    %c0_41 = arith.constant 0 : index
    %c2_42 = arith.constant 2 : index
    %c0_43 = arith.constant 0 : index
    %57 = vector.load %arg5[%c0_41, %c2_42, %c0_43] : memref<4x20x20xf32, #tpu.memory_space<vmem>>, vector<4x16x16xf32>
    %58 = vector.broadcast %56 : f32 to vector<4x16x16xf32>
    %59 = arith.mulf %58, %57 : vector<4x16x16xf32>
    %60 = arith.addf %55, %59 : vector<4x16x16xf32>
    %c11 = arith.constant 11 : index
    %61 = memref.load %arg2[%c11] : memref<25xf32, #tpu.memory_space<smem>>
    %c0_44 = arith.constant 0 : index
    %c2_45 = arith.constant 2 : index
    %c1_46 = arith.constant 1 : index
    %62 = vector.load %arg5[%c0_44, %c2_45, %c1_46] : memref<4x20x20xf32, #tpu.memory_space<vmem>>, vector<4x16x16xf32>
    %63 = vector.broadcast %61 : f32 to vector<4x16x16xf32>
    %64 = arith.mulf %63, %62 : vector<4x16x16xf32>
    %65 = arith.addf %60, %64 : vector<4x16x16xf32>
    %c12 = arith.constant 12 : index
    %66 = memref.load %arg2[%c12] : memref<25xf32, #tpu.memory_space<smem>>
    %c0_47 = arith.constant 0 : index
    %c2_48 = arith.constant 2 : index
    %c2_49 = arith.constant 2 : index
    %67 = vector.load %arg5[%c0_47, %c2_48, %c2_49] : memref<4x20x20xf32, #tpu.memory_space<vmem>>, vector<4x16x16xf32>
    %68 = vector.broadcast %66 : f32 to vector<4x16x16xf32>
    %69 = arith.mulf %68, %67 : vector<4x16x16xf32>
    %70 = arith.addf %65, %69 : vector<4x16x16xf32>
    %c13 = arith.constant 13 : index
    %71 = memref.load %arg2[%c13] : memref<25xf32, #tpu.memory_space<smem>>
    %c0_50 = arith.constant 0 : index
    %c2_51 = arith.constant 2 : index
    %c3_52 = arith.constant 3 : index
    %72 = vector.load %arg5[%c0_50, %c2_51, %c3_52] : memref<4x20x20xf32, #tpu.memory_space<vmem>>, vector<4x16x16xf32>
    %73 = vector.broadcast %71 : f32 to vector<4x16x16xf32>
    %74 = arith.mulf %73, %72 : vector<4x16x16xf32>
    %75 = arith.addf %70, %74 : vector<4x16x16xf32>
    %c14 = arith.constant 14 : index
    %76 = memref.load %arg2[%c14] : memref<25xf32, #tpu.memory_space<smem>>
    %c0_53 = arith.constant 0 : index
    %c2_54 = arith.constant 2 : index
    %c4_55 = arith.constant 4 : index
    %77 = vector.load %arg5[%c0_53, %c2_54, %c4_55] : memref<4x20x20xf32, #tpu.memory_space<vmem>>, vector<4x16x16xf32>
    %78 = vector.broadcast %76 : f32 to vector<4x16x16xf32>
    %79 = arith.mulf %78, %77 : vector<4x16x16xf32>
    %80 = arith.addf %75, %79 : vector<4x16x16xf32>
    %c15 = arith.constant 15 : index
    %81 = memref.load %arg2[%c15] : memref<25xf32, #tpu.memory_space<smem>>
    %c0_56 = arith.constant 0 : index
    %c3_57 = arith.constant 3 : index
    %c0_58 = arith.constant 0 : index
    %82 = vector.load %arg5[%c0_56, %c3_57, %c0_58] : memref<4x20x20xf32, #tpu.memory_space<vmem>>, vector<4x16x16xf32>
    %83 = vector.broadcast %81 : f32 to vector<4x16x16xf32>
    %84 = arith.mulf %83, %82 : vector<4x16x16xf32>
    %85 = arith.addf %80, %84 : vector<4x16x16xf32>
    %c16 = arith.constant 16 : index
    %86 = memref.load %arg2[%c16] : memref<25xf32, #tpu.memory_space<smem>>
    %c0_59 = arith.constant 0 : index
    %c3_60 = arith.constant 3 : index
    %c1_61 = arith.constant 1 : index
    %87 = vector.load %arg5[%c0_59, %c3_60, %c1_61] : memref<4x20x20xf32, #tpu.memory_space<vmem>>, vector<4x16x16xf32>
    %88 = vector.broadcast %86 : f32 to vector<4x16x16xf32>
    %89 = arith.mulf %88, %87 : vector<4x16x16xf32>
    %90 = arith.addf %85, %89 : vector<4x16x16xf32>
    %c17 = arith.constant 17 : index
    %91 = memref.load %arg2[%c17] : memref<25xf32, #tpu.memory_space<smem>>
    %c0_62 = arith.constant 0 : index
    %c3_63 = arith.constant 3 : index
    %c2_64 = arith.constant 2 : index
    %92 = vector.load %arg5[%c0_62, %c3_63, %c2_64] : memref<4x20x20xf32, #tpu.memory_space<vmem>>, vector<4x16x16xf32>
    %93 = vector.broadcast %91 : f32 to vector<4x16x16xf32>
    %94 = arith.mulf %93, %92 : vector<4x16x16xf32>
    %95 = arith.addf %90, %94 : vector<4x16x16xf32>
    %c18 = arith.constant 18 : index
    %96 = memref.load %arg2[%c18] : memref<25xf32, #tpu.memory_space<smem>>
    %c0_65 = arith.constant 0 : index
    %c3_66 = arith.constant 3 : index
    %c3_67 = arith.constant 3 : index
    %97 = vector.load %arg5[%c0_65, %c3_66, %c3_67] : memref<4x20x20xf32, #tpu.memory_space<vmem>>, vector<4x16x16xf32>
    %98 = vector.broadcast %96 : f32 to vector<4x16x16xf32>
    %99 = arith.mulf %98, %97 : vector<4x16x16xf32>
    %100 = arith.addf %95, %99 : vector<4x16x16xf32>
    %c19 = arith.constant 19 : index
    %101 = memref.load %arg2[%c19] : memref<25xf32, #tpu.memory_space<smem>>
    %c0_68 = arith.constant 0 : index
    %c3_69 = arith.constant 3 : index
    %c4_70 = arith.constant 4 : index
    %102 = vector.load %arg5[%c0_68, %c3_69, %c4_70] : memref<4x20x20xf32, #tpu.memory_space<vmem>>, vector<4x16x16xf32>
    %103 = vector.broadcast %101 : f32 to vector<4x16x16xf32>
    %104 = arith.mulf %103, %102 : vector<4x16x16xf32>
    %105 = arith.addf %100, %104 : vector<4x16x16xf32>
    %c20 = arith.constant 20 : index
    %106 = memref.load %arg2[%c20] : memref<25xf32, #tpu.memory_space<smem>>
    %c0_71 = arith.constant 0 : index
    %c4_72 = arith.constant 4 : index
    %c0_73 = arith.constant 0 : index
    %107 = vector.load %arg5[%c0_71, %c4_72, %c0_73] : memref<4x20x20xf32, #tpu.memory_space<vmem>>, vector<4x16x16xf32>
    %108 = vector.broadcast %106 : f32 to vector<4x16x16xf32>
    %109 = arith.mulf %108, %107 : vector<4x16x16xf32>
    %110 = arith.addf %105, %109 : vector<4x16x16xf32>
    %c21 = arith.constant 21 : index
    %111 = memref.load %arg2[%c21] : memref<25xf32, #tpu.memory_space<smem>>
    %c0_74 = arith.constant 0 : index
    %c4_75 = arith.constant 4 : index
    %c1_76 = arith.constant 1 : index
    %112 = vector.load %arg5[%c0_74, %c4_75, %c1_76] : memref<4x20x20xf32, #tpu.memory_space<vmem>>, vector<4x16x16xf32>
    %113 = vector.broadcast %111 : f32 to vector<4x16x16xf32>
    %114 = arith.mulf %113, %112 : vector<4x16x16xf32>
    %115 = arith.addf %110, %114 : vector<4x16x16xf32>
    %c22 = arith.constant 22 : index
    %116 = memref.load %arg2[%c22] : memref<25xf32, #tpu.memory_space<smem>>
    %c0_77 = arith.constant 0 : index
    %c4_78 = arith.constant 4 : index
    %c2_79 = arith.constant 2 : index
    %117 = vector.load %arg5[%c0_77, %c4_78, %c2_79] : memref<4x20x20xf32, #tpu.memory_space<vmem>>, vector<4x16x16xf32>
    %118 = vector.broadcast %116 : f32 to vector<4x16x16xf32>
    %119 = arith.mulf %118, %117 : vector<4x16x16xf32>
    %120 = arith.addf %115, %119 : vector<4x16x16xf32>
    %c23 = arith.constant 23 : index
    %121 = memref.load %arg2[%c23] : memref<25xf32, #tpu.memory_space<smem>>
    %c0_80 = arith.constant 0 : index
    %c4_81 = arith.constant 4 : index
    %c3_82 = arith.constant 3 : index
    %122 = vector.load %arg5[%c0_80, %c4_81, %c3_82] : memref<4x20x20xf32, #tpu.memory_space<vmem>>, vector<4x16x16xf32>
    %123 = vector.broadcast %121 : f32 to vector<4x16x16xf32>
    %124 = arith.mulf %123, %122 : vector<4x16x16xf32>
    %125 = arith.addf %120, %124 : vector<4x16x16xf32>
    %c24 = arith.constant 24 : index
    %126 = memref.load %arg2[%c24] : memref<25xf32, #tpu.memory_space<smem>>
    %c0_83 = arith.constant 0 : index
    %c4_84 = arith.constant 4 : index
    %c4_85 = arith.constant 4 : index
    %127 = vector.load %arg5[%c0_83, %c4_84, %c4_85] : memref<4x20x20xf32, #tpu.memory_space<vmem>>, vector<4x16x16xf32>
    %128 = vector.broadcast %126 : f32 to vector<4x16x16xf32>
    %129 = arith.mulf %128, %127 : vector<4x16x16xf32>
    %130 = arith.addf %125, %129 : vector<4x16x16xf32>
    %c0_86 = arith.constant 0 : index
    %c0_87 = arith.constant 0 : index
    %c0_88 = arith.constant 0 : index
    %c0_89 = arith.constant 0 : index
    %131 = vector.load %arg3[%c0_86, %c0_87, %c0_88, %c0_89] : memref<1x4x16x16xf32, #tpu.memory_space<vmem>>, vector<1x4x16x16xf32>
    %132 = vector.shape_cast %131 : vector<1x4x16x16xf32> to vector<4x16x16xf32>
    %133 = arith.addf %132, %130 : vector<4x16x16xf32>
    %c0_90 = arith.constant 0 : index
    %c0_91 = arith.constant 0 : index
    %c0_92 = arith.constant 0 : index
    %c0_93 = arith.constant 0 : index
    %134 = vector.load %arg4[%c0_90, %c0_91, %c0_92, %c0_93] : memref<1x4x16x16xf32, #tpu.memory_space<vmem>>, vector<1x4x16x16xf32>
    %135 = vector.shape_cast %134 : vector<1x4x16x16xf32> to vector<4x16x16xf32>
    %136 = vector.shape_cast %133 : vector<4x16x16xf32> to vector<1x4x16x16xf32>
    tpu.vector_store %arg4[%c0_90, %c0_91, %c0_92, %c0_93], %136 {strides = array<i32>} : memref<1x4x16x16xf32, #tpu.memory_space<vmem>>, vector<1x4x16x16xf32>,
    return
  }
  func.func @transform_0(%arg0: i32, %arg1: i32) -> i32 {
    %c0_i32 = arith.constant 0 : i32
    %c0_i32_0 = arith.constant 0 : i32
    return %c0_i32 : i32
  }
  func.func @transform_1(%arg0: i32, %arg1: i32) -> (i32, i32, i32, i32) {
    %c0_i32 = arith.constant 0 : i32
    %c0_i32_0 = arith.constant 0 : i32
    %c0_i32_1 = arith.constant 0 : i32
    return %arg0, %arg1, %c0_i32, %c0_i32_0 : i32, i32, i32, i32
  }
  func.func @transform_2(%arg0: i32, %arg1: i32) -> (i32, i32, i32, i32) {
    %c0_i32 = arith.constant 0 : i32
    %c0_i32_0 = arith.constant 0 : i32
    %c0_i32_1 = arith.constant 0 : i32
    return %arg0, %arg1, %c0_i32, %c0_i32_0 : i32, i32, i32, i32
  }
}

</mosaic_0001>

<bundles_post_ra>
// kernel: lateral_inhibition.1
= control target key start
LH: loop header
LB: loop body
LE: loop exit
PB: predicated region body
PF: predicated region fallthrough
CT: control target
= control target key end

     0   :  { %7 = vsyncpa [#allocation6], 0  ;;  %s2613_s0 = inlined_call_operand.vmem [shape: f32[25], index: 0, kind: input, shape index: {}]   ;;  %s2614_s1 = inlined_call_operand.hbm [shape: f32[2,4,16,16], index: 1, kind: input, shape index: {}]   ;;  %s2615_s2 = inlined_call_operand.hbm [shape: f32[2,4,16,16], index: 2, kind: output, shape index: {}]  }
   0x1   :  { %8 = vsyncpa [#allocation4], 0 }
   0x2   :  { %10 = vsyncpa [#allocation4 + $0x1], 0 }
   0x3   :  { %11 = vsyncpa [#allocation5], 0 }
   0x4   :  { %13 = vsyncpa [#allocation5 + $0x1], 0  ;;  %s1820_s9 = smov 0   ;;  %s1822_s10 = smov 0  }
   0x5   :  { %s1824_s11 = smov 0   ;;  %s1826_s12 = smov 0  }
   0x6   :  { %s1828_s13 = smov 0   ;;  %s1830_s14 = smov 0  }
   0x7 LB: > { %s1535_s15 = sadd.s32 4294967295, %s1792_s14   ;;  %s1536_s16 = sadd.s32 4294967294, %s1792_s14   ;;  %s1792_s14 = sphi %s1830_s14, %s19_s14   ;;  %s1788_s13 = sphi %s1828_s13, %s2627_s13   ;;  %s1784_s12 = sphi %s1826_s12, %s2626_s12   ;;  %s1780_s11 = sphi %s1824_s11, %s2625_s11   ;;  %s1776_s10 = sphi %s1822_s10, %s2624_s10   ;;  %s1772_s9 = sphi %s1820_s9, %s2623_s9  }
   0x8   : > { %s61_s17 = sadd.s32 1, %s1780_s11  ;;  %p68_p0 = scmp.ne.s32.totalorder %s1780_s11, %s1776_s10 }
   0x9   : > { %p69_p1 = scmp.eq.s32.totalorder %s1792_s14, 0  ;;  %p74_p2 = scmp.ne.s32.totalorder %s1776_s10, %s1772_s9 }
   0xa   : > { %p1858_p3 = scmp.eq.s32.totalorder %s1535_s15, 0  ;;  %p100_p4 = scmp.eq.s32.totalorder %s1535_s15, 1 }
   0xb   : > { %p1862_p5 = por %p69_p1, %p68_p0  ;;  %p106_p6 = scmp.eq.s32.totalorder %s1536_s16, 1 }
   0xc   : > { %p1868_p7 = por %p1858_p3, %p74_p2  ;;  %p1872_p8 = por %p100_p4, %p68_p0 }
   0xd   : > { %p1876_p9 = por %p106_p6, %p74_p2  ;;  %p1537_p10 = scmp.ge.s32.totalorder %s1792_s14, 1 }
   0xe   : > { %p113_p11 = scmp.lt.s32.totalorder %s1792_s14, 3  ;;  %s125_s25 = sshll.u32 %s2613_s0, 4  ;;  %s126_s25 = int_to_ptr.vmem [resolvable:$true] %s125_s25 }
   0xf   : > { %p1539_p13 = scmp.ge.s32.totalorder %s1792_s14, 2  ;;  %p1599_p0 = scmp.lt.s32.totalorder %s1792_s14, 2 }
  0x10   : > { %p1885_p12 = pnand %p1537_p10, %p113_p11  ;;  %s31_s28 = sadd.s32 1, %s1788_s13 }
  0x11   : > { %p1895_p2 = pnand %p1599_p0, %p1862_p5  ;;  %p33_p6 = scmp.ge.s32.totalorder %s31_s28, 2 }
  0x12   : > { %p1586_p1 = pneg %p1885_p12  ;;  %s136_s29 = sand.u32 1, %s1780_s11  }
  0x13   : > { %s1794_s30 = smov [#allocation3]   ;;  %s2629_s28 = smov (%p33_p6, %s31_s28), 0 }
  0x14   : > { %p1587_p4 = pnand %p1586_p1, %p1858_p3  ;;  %s1540_s3 = sshll.u32 %s136_s29, 6 }
  0x15   : > { %s56_s4 = ssub.s32 %s1788_s13, %s2629_s28  ;;  %s1576_s5 = sshll.u32 %s1788_s13, 6 }
  0x16   : > { %1589 = dma.vmem_to_smem (!%p1587_p4), %s126_s25, 16, %s1794_s30, [#allocation6]  }
  0x17   : > { %p59_p10 = scmp.eq.s32.totalorder %s56_s4, 0  ;;  %s148_s8 = scalar_lea.hbm %s2614_s1, %s1576_s5 }
  0x18   : > { %s140_s15 = scalar_lea.vmem [#allocation7], %s1540_s3  ;;  %s149_s23 = sshll.u32 %s148_s8, 4  ;;  %s150_s23 = int_to_ptr.hbm [resolvable:$true] %s149_s23 }
  0x19   : > { %s151_s16 = sshll.u32 %s140_s15, 4  ;;  %s137_s24 = scalar_lea.sflag [#allocation4], %s136_s29  ;;  %s152_s16 = int_to_ptr.vmem [resolvable:$true] %s151_s16 }
  0x1a   : > { %s1914_s19 = scalar_select %p59_p10, %s1780_s11, %s61_s17  }
  0x1b   : > { %s1795_s25 = smov 128   ;;  %s1796_s30 = smov 8  }
  0x1c   : > { %1593 = dma.hbm_to_vmem [thread:$0]  (!%p1895_p2), %s150_s23, 1024, %s152_s16, %s137_s24, %s1795_s25, %s1795_s25, %s1796_s30  }
  0x1d   : > { %163 = sbr.rel (%p1885_p12) target bundleno = 715 (0x2cb), region = 28 }
  0x22   : > { %1759 = dma.done.wait (%p1858_p3), [#allocation6], 16  }
  0x23   : > { %1761 = vsyncadd (%p1858_p3), [#allocation6], 4294967280  ;;  %s1925_s17 = sand.u32 1, %s1776_s10  }
  0x24   : > { %s1545_s29 = sshll.u32 %s1925_s17, 6  ;;  %s171_s3 = scalar_lea.sflag [#allocation4], %s1925_s17 }
  0x25   : > { %s1931_s27 = scalar_lea.vmem [#allocation7], %s1545_s29 }
  0x26   : > { %1763 = dma.done.wait (%p1868_p7), %s171_s3, 1024  }
  0x27   : > { %1765 = vsyncadd (%p1868_p7), %s171_s3, 4294966272 }
  0x28   : > { %180 = sfence }
  0x29   : > { %v215_v0 = vld [vmem:[%s1931_s27 + $0x10] sm:$0xff]  ;;  %v213_v1 = vld [vmem:[%s1931_s27] sm:$0xff]  ;;  %s1797_s18 = smov 2   ;;  %v216_v3 = vld [vmem:[%s1931_s27 + $0x18] sm:$0xff]  ;;  %vm199_vm0 = vcmask 162816   ;;  %v1798_v8 = vmov 0.0  }
  0x2a   : > { %233 = vrot.lane.b32.xlu1 %v215_v0, %s1797_s18  ;;  %229 = vrot.lane.b32.xlu0 %v213_v1, %s1797_s18  ;;  %v217_v2 = vld [vmem:[%s1931_s27 + $0x20] sm:$0xff]  ;;  %v214_v4 = vld [vmem:[%s1931_s27 + $0x8] sm:$0xff]  ;;  %207 = vst.msk [vmem:[#allocation2 + $0x30] sm:$0xff] %vm199_vm0, %v1798_v8  ;;  %vm202_vm1 = vcmask 158720   ;;  %vm253_vm2 = vcmask 146448   ;;  %s1547_s20 = sld [smem:[#allocation3 + $0x1]] }
  0x2b   : > { %237 = vrot.lane.b32.xlu2 %v217_v2, %s1797_s18  ;;  %v218_v5 = vld [vmem:[%s1931_s27 + $0x28] sm:$0xff]  ;;  %v219_v6 = vld [vmem:[%s1931_s27 + $0x30] sm:$0xff]  ;;  %v220_v7 = vld [vmem:[%s1931_s27 + $0x38] sm:$0xff]  ;;  %208 = vst.msk [vmem:[#allocation2 + $0x38] sm:$0xff] %vm199_vm0, %v1798_v8  ;;  %s1799_s26 = smov 127   ;;  %s1548_s4 = sld [smem:[#allocation3 + $0x2]] }
  0x2c   : > { %200 = vst.msk [vmem:[#allocation2] sm:$0xff] %vm199_vm0, %v1798_v8  ;;  %s1800_s5 = smov 126   ;;  %s1549_s6 = sld [smem:[#allocation3 + $0x3]]  ;;  %vm1408_vm3 = vcmask 130048  }
  0x2d   : > { %201 = vst.msk [vmem:[#allocation2 + $0x8] sm:$0xff] %vm199_vm0, %v1798_v8  ;;  %s1801_s7 = smov 125   ;;  %s1550_s8 = sld [smem:[#allocation3 + $0x4]] }
  0x2e   : > { %204 = vst.msk [vmem:[#allocation2 + $0x18] sm:$0xff] %vm199_vm0, %v1798_v8  ;;  %s1802_s15 = smov 124   ;;  %s1552_s16 = sld [smem:[#allocation3 + $0x6]] }
  0x2f   : > { %205 = vst.msk [vmem:[#allocation2 + $0x20] sm:$0xff] %vm199_vm0, %v1798_v8  ;;  %s1553_s23 = sld [smem:[#allocation3 + $0x7]] }
  0x30   : > { %210 = vst.msk [vmem:[#allocation2 + $0x48] sm:$0xff] %vm199_vm0, %v1798_v8  ;;  %v289_v13 = vstv %s1547_s20  ;;  %s1554_s24 = sld [smem:[#allocation3 + $0x8]] }
  0x31   : > { %211 = vst.msk [vmem:[#allocation2 + $0x50] sm:$0xff] %vm199_vm0, %v1798_v8  ;;  %v339_v28 = vstv %s1548_s4  ;;  %s262_s25 = sld [smem:[#allocation3]] }
  0x32   : > { %235 = vrot.lane.b32.xlu1 %v216_v3, %s1797_s18  ;;  %231 = vrot.lane.b32.xlu0 %v214_v4, %s1797_s18  ;;  %209 = vst.msk [vmem:[#allocation2 + $0x40] sm:$0xf] %vm202_vm1, %v1798_v8  ;;  %v389_v41 = vstv %s1549_s6  ;;  %s1555_s30 = sld [smem:[#allocation3 + $0x9]] }
  0x33   : > { %239 = vrot.lane.b32.xlu2 %v218_v5, %s1797_s18  ;;  %203 = vst.msk [vmem:[#allocation2 + $0x10] sm:$0xf] %vm202_vm1, %v1798_v8  ;;  %v439_v51 = vstv %s1550_s8  ;;  %s1551_s3 = sld [smem:[#allocation3 + $0x5]] }
  0x34   : > { %206 = vst.msk [vmem:[#allocation2 + $0x28] sm:$0xf] %vm202_vm1, %v1798_v8  ;;  %v515_v59 = vstv %s1552_s16  ;;  %s1558_s20 = sld [smem:[#allocation3 + $0xc]] }
  0x35   : > { %212 = vst.msk [vmem:[#allocation2 + $0x58] sm:$0xf] %vm202_vm1, %v1798_v8  ;;  %s1559_s4 = sld [smem:[#allocation3 + $0xd]] }
  0x36   : > { %s1560_s6 = sld [smem:[#allocation3 + $0xe]] }
  0x37   : > { %s1562_s8 = sld [smem:[#allocation3 + $0x10]] }
  0x38   : > { %s1556_s16 = sld [smem:[#allocation3 + $0xa]] }
  0x3a   : > { %241 = vrot.lane.b32.xlu0 %v219_v6, %s1797_s18  ;;  %243 = vrot.lane.b32.xlu1 %v220_v7, %s1797_s18  ;;  %s1557_s18 = sld [smem:[#allocation3 + $0xb]] }
  0x85   : > { %v238_v9 = vpop.permute.xlu2 %237 }
  0x86   : > { %258 = vst.msk [vmem:[#allocation2 + $0x32] sm:$0xff] %vm253_vm2, %v238_v9 }
  0x8d   : > { %v240_v10 = vpop.permute.xlu2 %239  ;;  %v1973_v29 = vld [vmem:[#allocation2 + $0x30] sm:$0xff] }
  0x8e   : > { %259 = vst.msk [vmem:[#allocation2 + $0x3a] sm:$0xff] %vm253_vm2, %v240_v10  ;;  %v294_v33 = vmul.f32 %v289_v13, %v1973_v29  ;;  %v344_v40 = vmul.f32 %v339_v28, %v1973_v29  ;;  %v394_v45 = vmul.f32 %v389_v41, %v1973_v29  ;;  %v444_v61 = vmul.f32 %v439_v51, %v1973_v29  ;;  %v2051_v7 = vld [vmem:[#allocation2 + $0x31] sm:$0xff] }
  0x8f   : > { %v520_v10 = vmul.f32 %v515_v59, %v2051_v7 }
  0x95   : > { %v1959_v20 = vld [vmem:[#allocation2 + $0x38] sm:$0xff] }
  0x96   : > { %v295_v21 = vmul.f32 %v289_v13, %v1959_v20  ;;  %v345_v43 = vmul.f32 %v339_v28, %v1959_v20  ;;  %v395_v50 = vmul.f32 %v389_v41, %v1959_v20  ;;  %v445_v55 = vmul.f32 %v439_v51, %v1959_v20 }
  0x9c   : > { %v234_v11 = vpop.permute.xlu1 %233  ;;  %v230_v12 = vpop.permute.xlu0 %229 }
  0x9d   : > { %256 = vst.msk [vmem:[#allocation2 + $0x1a] sm:$0xff] %vm253_vm2, %v234_v11 }
  0x9e   : > { %254 = vst.msk [vmem:[#allocation2 + $0x2] sm:$0xff] %vm253_vm2, %v230_v12  ;;  %v2061_v12 = vld [vmem:[#allocation2 + $0x39] sm:$0xff] }
  0xa4   : > { %v236_v14 = vpop.permute.xlu1 %235  ;;  %v232_v15 = vpop.permute.xlu0 %231  ;;  %v1949_v16 = vld [vmem:[#allocation2 + $0x18] sm:$0xff] }
  0xa5   : > { %257 = vst.msk [vmem:[#allocation2 + $0x22] sm:$0xff] %vm253_vm2, %v236_v14  ;;  %v292_v17 = vmul.f32 %v289_v13, %v1949_v16  ;;  %v1953_v18 = vld [vmem:[#allocation2] sm:$0xff]  ;;  %v342_v39 = vmul.f32 %v339_v28, %v1949_v16  ;;  %v392_v47 = vmul.f32 %v389_v41, %v1949_v16  ;;  %v442_v52 = vmul.f32 %v439_v51, %v1949_v16 }
  0xa6   : > { %255 = vst.msk [vmem:[#allocation2 + $0xa] sm:$0xff] %vm253_vm2, %v232_v15  ;;  %v290_v19 = vmul.f32 %v289_v13, %v1953_v18  ;;  %v340_v31 = vmul.f32 %v339_v28, %v1953_v18  ;;  %v390_v46 = vmul.f32 %v389_v41, %v1953_v18  ;;  %v440_v54 = vmul.f32 %v439_v51, %v1953_v18  ;;  %v2027_v58 = vld [vmem:[#allocation2 + $0x1] sm:$0xff]  ;;  %v2049_v6 = vld [vmem:[#allocation2 + $0x19] sm:$0xff] }
  0xa7   : > { %310 = vrot.lane.b32.xlu1 %v292_v17, %s1799_s26  ;;  %v516_v60 = vmul.f32 %v515_v59, %v2027_v58  ;;  %v518_v9 = vmul.f32 %v515_v59, %v2049_v6  ;;  %v565_v14 = vstv %s1553_s23  ;;  %v521_v17 = vmul.f32 %v515_v59, %v2061_v12  ;;  %s1563_s23 = sld [smem:[#allocation3 + $0x11]] }
  0xa8   : > { %306 = vrot.lane.b32.xlu2 %v290_v19, %s1799_s26 }
  0xac   : > { %v242_v22 = vpop.permute.xlu0 %241  ;;  %v1962_v23 = vld [vmem:[#allocation2 + $0x20] sm:$0xff]  ;;  %v244_v24 = vpop.permute.xlu1 %243 }
  0xad   : > { %260 = vst.msk [vmem:[#allocation2 + $0x4a] sm:$0xff] %vm253_vm2, %v242_v22  ;;  %v1965_v25 = vld [vmem:[#allocation2 + $0x8] sm:$0xff]  ;;  %v293_v26 = vmul.f32 %v289_v13, %v1962_v23  ;;  %v343_v36 = vmul.f32 %v339_v28, %v1962_v23  ;;  %v393_v49 = vmul.f32 %v389_v41, %v1962_v23  ;;  %v443_v57 = vmul.f32 %v439_v51, %v1962_v23 }
  0xae   : > { %v291_v27 = vmul.f32 %v289_v13, %v1965_v25  ;;  %261 = vst.msk [vmem:[#allocation2 + $0x52] sm:$0xff] %vm253_vm2, %v244_v24  ;;  %v341_v37 = vmul.f32 %v339_v28, %v1965_v25  ;;  %v391_v42 = vmul.f32 %v389_v41, %v1965_v25  ;;  %v441_v56 = vmul.f32 %v439_v51, %v1965_v25  ;;  %v2035_v63 = vld [vmem:[#allocation2 + $0x21] sm:$0xff]  ;;  %v2037_v0 = vld [vmem:[#allocation2 + $0x9] sm:$0xff] }
  0xaf   : > { %316 = vrot.lane.b32.xlu1 %v295_v21, %s1799_s26  ;;  %v519_v1 = vmul.f32 %v515_v59, %v2035_v63  ;;  %v517_v3 = vmul.f32 %v515_v59, %v2037_v0  ;;  %v567_v15 = vmul.f32 %v565_v14, %v2037_v0  ;;  %v570_v22 = vmul.f32 %v565_v14, %v2051_v7 }
  0xb0   : > { %308 = vrot.lane.b32.xlu0 %v291_v27, %s1799_s26  ;;  %312 = vrot.lane.b32.xlu2 %v293_v26, %s1799_s26  ;;  %v566_v24 = vmul.f32 %v565_v14, %v2027_v58  ;;  %v568_v26 = vmul.f32 %v565_v14, %v2049_v6 }
  0xb4   : > { %v1975_v30 = vld [vmem:[#allocation2 + $0x48] sm:$0xff] }
  0xb5   : > { %v296_v32 = vmul.f32 %v289_v13, %v1975_v30  ;;  %v1983_v34 = vld [vmem:[#allocation2 + $0x50] sm:$0xff]  ;;  %v346_v38 = vmul.f32 %v339_v28, %v1975_v30  ;;  %v396_v53 = vmul.f32 %v389_v41, %v1975_v30  ;;  %v446_v62 = vmul.f32 %v439_v51, %v1975_v30 }
  0xb6   : > { %v297_v35 = vmul.f32 %v289_v13, %v1983_v34  ;;  %v347_v44 = vmul.f32 %v339_v28, %v1983_v34  ;;  %v397_v48 = vmul.f32 %v389_v41, %v1983_v34  ;;  %v447_v2 = vmul.f32 %v439_v51, %v1983_v34  ;;  %v2047_v5 = vld [vmem:[#allocation2 + $0x49] sm:$0xff]  ;;  %v2063_v13 = vld [vmem:[#allocation2 + $0x51] sm:$0xff] }
  0xb7   : > { %356 = vrot.lane.b32.xlu1 %v340_v31, %s1800_s5  ;;  %v522_v8 = vmul.f32 %v515_v59, %v2047_v5  ;;  %v523_v19 = vmul.f32 %v515_v59, %v2063_v13  ;;  %v573_v31 = vmul.f32 %v565_v14, %v2063_v13 }
  0xb8   : > { %314 = vrot.lane.b32.xlu0 %v294_v33, %s1799_s26  ;;  %318 = vrot.lane.b32.xlu2 %v296_v32, %s1799_s26  ;;  %v569_v32 = vmul.f32 %v565_v14, %v2035_v63  ;;  %v571_v33 = vmul.f32 %v565_v14, %v2061_v12 }
  0xbf   : > { %362 = vrot.lane.b32.xlu1 %v343_v36, %s1800_s5 }
  0xc0   : > { %320 = vrot.lane.b32.xlu0 %v297_v35, %s1799_s26  ;;  %358 = vrot.lane.b32.xlu2 %v341_v37, %s1800_s5 }
  0xc7   : > { %368 = vrot.lane.b32.xlu1 %v346_v38, %s1800_s5  ;;  %v615_v38 = vstv %s1554_s24  ;;  %s1564_s24 = sld [smem:[#allocation3 + $0x12]] }
  0xc8   : > { %360 = vrot.lane.b32.xlu0 %v342_v39, %s1800_s5  ;;  %364 = vrot.lane.b32.xlu2 %v344_v40, %s1800_s5  ;;  %v618_v39 = vmul.f32 %v615_v38, %v2049_v6  ;;  %v572_v40 = vmul.f32 %v565_v14, %v2047_v5  ;;  %v616_v41 = vmul.f32 %v615_v38, %v2027_v58 }
  0xc9   : > { %v620_v59 = vmul.f32 %v615_v38, %v2051_v7 }
  0xcf   : > { %408 = vrot.lane.b32.xlu1 %v391_v42, %s1801_s7 }
  0xd0   : > { %366 = vrot.lane.b32.xlu0 %v345_v43, %s1800_s5  ;;  %370 = vrot.lane.b32.xlu2 %v347_v44, %s1800_s5 }
  0xd7   : > { %414 = vrot.lane.b32.xlu1 %v394_v45, %s1801_s7  ;;  %v621_v45 = vmul.f32 %v615_v38, %v2061_v12 }
  0xd8   : > { %406 = vrot.lane.b32.xlu0 %v390_v46, %s1801_s7  ;;  %410 = vrot.lane.b32.xlu2 %v392_v47, %s1801_s7  ;;  %v617_v46 = vmul.f32 %v615_v38, %v2037_v0  ;;  %v619_v47 = vmul.f32 %v615_v38, %v2035_v63 }
  0xdf   : > { %420 = vrot.lane.b32.xlu1 %v397_v48, %s1801_s7  ;;  %v2097_v48 = vstv %s262_s25  ;;  %s1565_s25 = sld [smem:[#allocation3 + $0x13]] }
  0xe0   : > { %412 = vrot.lane.b32.xlu0 %v393_v49, %s1801_s7  ;;  %416 = vrot.lane.b32.xlu2 %v395_v50, %s1801_s7  ;;  %v279_v49 = vmul.f32 %v2097_v48, %v1983_v34  ;;  %v274_v34 = vmul.f32 %v2097_v48, %v1949_v16 }
  0xe7   : > { %460 = vrot.lane.b32.xlu1 %v442_v52, %s1802_s15 }
  0xe8   : > { %418 = vrot.lane.b32.xlu0 %v396_v53, %s1801_s7  ;;  %456 = vrot.lane.b32.xlu2 %v440_v54, %s1802_s15  ;;  %v2105_v53 = vstv %s1555_s30  ;;  %s1567_s30 = sld [smem:[#allocation3 + $0x15]] }
  0xe9   : > { %v669_v16 = vmul.f32 %v2105_v53, %v2035_v63 }
  0xef   : > { %466 = vrot.lane.b32.xlu1 %v445_v55, %s1802_s15  ;;  %v666_v55 = vmul.f32 %v2105_v53, %v2027_v58 }
  0xf0   : > { %458 = vrot.lane.b32.xlu0 %v441_v56, %s1802_s15  ;;  %462 = vrot.lane.b32.xlu2 %v443_v57, %s1802_s15  ;;  %v278_v57 = vmul.f32 %v2097_v48, %v1975_v30 }
  0xf7   : > { %532 = vrot.lane.b32.xlu1 %v516_v60, %s1799_s26  ;;  %v622_v60 = vmul.f32 %v615_v38, %v2047_v5 }
  0xf8   : > { %464 = vrot.lane.b32.xlu0 %v444_v61, %s1802_s15  ;;  %468 = vrot.lane.b32.xlu2 %v446_v62, %s1802_s15 }
  0xff   : > { %538 = vrot.lane.b32.xlu1 %v519_v1, %s1799_s26 }
 0x100   : > { %470 = vrot.lane.b32.xlu0 %v447_v2, %s1802_s15  ;;  %534 = vrot.lane.b32.xlu2 %v517_v3, %s1799_s26  ;;  %v273_v2 = vmul.f32 %v2097_v48, %v1965_v25 }
 0x102   : > { %v2045_v4 = vpop.permute.xlu2 %306 }
 0x107   : > { %544 = vrot.lane.b32.xlu1 %v522_v8, %s1799_s26 }
 0x108   : > { %536 = vrot.lane.b32.xlu0 %v518_v9, %s1799_s26  ;;  %540 = vrot.lane.b32.xlu2 %v520_v10, %s1799_s26 }
 0x10a   : > { %v2059_v11 = vpop.permute.xlu2 %312 }
 0x10f   : > { %584 = vrot.lane.b32.xlu1 %v567_v15, %s1800_s5  ;;  %v623_v15 = vmul.f32 %v615_v38, %v2063_v13 }
 0x110   : > { %542 = vrot.lane.b32.xlu0 %v521_v17, %s1799_s26  ;;  %546 = vrot.lane.b32.xlu2 %v523_v19, %s1799_s26  ;;  %v667_v17 = vmul.f32 %v2105_v53, %v2037_v0  ;;  %v277_v19 = vmul.f32 %v2097_v48, %v1959_v20  ;;  %v272_v20 = vmul.f32 %v2097_v48, %v1953_v18 }
 0x112   : > { %v319_v21 = vpop.permute.xlu2 %318  ;;  %v330_v38 = vadd.f32 %v2045_v4, %v272_v20 }
 0x113   : > { %v336_v61 = vadd.f32 %v319_v21, %v278_v57 }
 0x117   : > { %590 = vrot.lane.b32.xlu1 %v570_v22, %s1800_s5 }
 0x118   : > { %582 = vrot.lane.b32.xlu0 %v566_v24, %s1800_s5  ;;  %586 = vrot.lane.b32.xlu2 %v568_v26, %s1800_s5  ;;  %v276_v24 = vmul.f32 %v2097_v48, %v1973_v29  ;;  %v670_v29 = vmul.f32 %v2105_v53, %v2051_v7 }
 0x119   : > { %v311_v27 = vpop.permute.xlu1 %310 }
 0x11a   : > { %v359_v28 = vpop.permute.xlu2 %358  ;;  %v332_v62 = vadd.f32 %v311_v27, %v274_v34  ;;  %v2179_v34 = vld [vmem:[#allocation2 + $0x32] sm:$0xff] }
 0x11f   : > { %596 = vrot.lane.b32.xlu1 %v573_v31, %s1800_s5 }
 0x120   : > { %588 = vrot.lane.b32.xlu0 %v569_v32, %s1800_s5  ;;  %592 = vrot.lane.b32.xlu2 %v571_v33, %s1800_s5 }
 0x121   : > { %v317_v35 = vpop.permute.xlu1 %316 }
 0x122   : > { %v309_v36 = vpop.permute.xlu0 %308  ;;  %v2083_v37 = vpop.permute.xlu2 %364  ;;  %v335_v21 = vadd.f32 %v317_v35, %v277_v19  ;;  %v668_v35 = vmul.f32 %v2105_v53, %v2049_v6  ;;  %v2199_v19 = vld [vmem:[#allocation2 + $0x22] sm:$0xff] }
 0x123   : > { %v331_v10 = vadd.f32 %v309_v36, %v273_v2  ;;  %v672_v36 = vmul.f32 %v2105_v53, %v2047_v5 }
 0x125   : > { %v381_v25 = vadd.f32 %v359_v28, %v331_v10 }
 0x127   : > { %636 = vrot.lane.b32.xlu1 %v618_v39, %s1801_s7 }
 0x128   : > { %594 = vrot.lane.b32.xlu0 %v572_v40, %s1800_s5  ;;  %632 = vrot.lane.b32.xlu2 %v616_v41, %s1801_s7 }
 0x129   : > { %v2091_v42 = vpop.permute.xlu1 %356 }
 0x12a   : > { %v315_v43 = vpop.permute.xlu0 %314  ;;  %v371_v44 = vpop.permute.xlu2 %370  ;;  %v380_v39 = vadd.f32 %v2091_v42, %v330_v38  ;;  %v671_v42 = vmul.f32 %v2105_v53, %v2061_v12  ;;  %v791_v38 = vstv %s1558_s20  ;;  %s1570_s20 = sld [smem:[#allocation3 + $0x18]] }
 0x12b   : > { %v334_v33 = vadd.f32 %v315_v43, %v276_v24 }
 0x12d   : > { %v384_v18 = vadd.f32 %v2083_v37, %v334_v33 }
 0x12f   : > { %642 = vrot.lane.b32.xlu1 %v621_v45, %s1801_s7  ;;  %v2158_v45 = vld [vmem:[#allocation2 + $0xa] sm:$0xff] }
 0x130   : > { %634 = vrot.lane.b32.xlu0 %v617_v46, %s1801_s7  ;;  %638 = vrot.lane.b32.xlu2 %v619_v47, %s1801_s7  ;;  %v2160_v46 = vstv %s1551_s3  ;;  %v741_v47 = vstv %s1557_s18  ;;  %s1561_s3 = sld [smem:[#allocation3 + $0xf]] }
 0x131   : > { %v2103_v50 = vpop.permute.xlu1 %362  ;;  %v498_v37 = vmul.f32 %v2160_v46, %v2027_v58  ;;  %v501_v2 = vmul.f32 %v2160_v46, %v2035_v63  ;;  %v500_v63 = vmul.f32 %v2160_v46, %v2049_v6  ;;  %s1568_s18 = sld [smem:[#allocation3 + $0x16]] }
 0x132   : > { %v321_v51 = vpop.permute.xlu0 %320  ;;  %v411_v52 = vpop.permute.xlu2 %410 }
 0x133   : > { %v337_v54 = vadd.f32 %v321_v51, %v279_v49  ;;  %v275_v49 = vmul.f32 %v2097_v48, %v1962_v23 }
 0x135   : > { %v2109_v56 = vadd.f32 %v371_v44, %v337_v54  ;;  %v673_v54 = vmul.f32 %v2105_v53, %v2063_v13 }
 0x137   : > { %682 = vrot.lane.b32.xlu1 %v666_v55, %s1802_s15  ;;  %v333_v55 = vadd.f32 %v2059_v11, %v275_v49  ;;  %v2183_v11 = vld [vmem:[#allocation2 + $0x1a] sm:$0xff]  ;;  %v502_v49 = vmul.f32 %v2160_v46, %v2051_v7 }
 0x138   : > { %640 = vrot.lane.b32.xlu0 %v620_v59, %s1801_s7  ;;  %644 = vrot.lane.b32.xlu2 %v622_v60, %s1801_s7 }
 0x139   : > { %v369_v1 = vpop.permute.xlu1 %368  ;;  %v383_v23 = vadd.f32 %v2103_v50, %v333_v55 }
 0x13a   : > { %v361_v30 = vpop.permute.xlu0 %360  ;;  %v2122_v3 = vadd.f32 %v369_v1, %v336_v61  ;;  %v417_v8 = vpop.permute.xlu2 %416  ;;  %v2181_v61 = vld [vmem:[#allocation2 + $0x2] sm:$0xff]  ;;  %v746_v1 = vmul.f32 %v741_v47, %v2179_v34 }
 0x13b   : > { %v382_v9 = vadd.f32 %v361_v30, %v332_v62  ;;  %v742_v50 = vmul.f32 %v741_v47, %v2181_v61  ;;  %v744_v30 = vmul.f32 %v741_v47, %v2183_v11 }
 0x13d   : > { %v2126_v14 = vadd.f32 %v411_v52, %v382_v9  ;;  %v743_v52 = vmul.f32 %v741_v47, %v2158_v45 }
 0x13f   : > { %688 = vrot.lane.b32.xlu1 %v669_v16, %s1802_s15 }
 0x140   : > { %646 = vrot.lane.b32.xlu0 %v623_v15, %s1801_s7  ;;  %684 = vrot.lane.b32.xlu2 %v667_v17, %s1802_s15  ;;  %v2194_v15 = vld [vmem:[#allocation2 + $0x52] sm:$0xff] }
 0x141   : > { %v409_v22 = vpop.permute.xlu1 %408  ;;  %v749_v24 = vmul.f32 %v741_v47, %v2194_v15 }
 0x142   : > { %v367_v26 = vpop.permute.xlu0 %366  ;;  %v2138_v27 = vadd.f32 %v409_v22, %v381_v25  ;;  %v457_v31 = vpop.permute.xlu2 %456  ;;  %v2201_v25 = vld [vmem:[#allocation2 + $0x3a] sm:$0xff] }
 0x143   : > { %v385_v32 = vadd.f32 %v367_v26, %v335_v21  ;;  %v745_v26 = vmul.f32 %v741_v47, %v2199_v19 }
 0x145   : > { %v2144_v28 = vadd.f32 %v417_v8, %v385_v32 }
 0x147   : > { %694 = vrot.lane.b32.xlu1 %v672_v36, %s1802_s15  ;;  %v503_v36 = vmul.f32 %v2160_v46, %v2061_v12 }
 0x148   : > { %686 = vrot.lane.b32.xlu0 %v668_v35, %s1802_s15  ;;  %690 = vrot.lane.b32.xlu2 %v670_v29, %s1802_s15  ;;  %v2217_v29 = vld [vmem:[#allocation2 + $0x4a] sm:$0xff] }
 0x149   : > { %v415_v40 = vpop.permute.xlu1 %414 }
 0x14a   : > { %v407_v41 = vpop.permute.xlu0 %406  ;;  %v2156_v43 = vadd.f32 %v415_v40, %v384_v18  ;;  %v463_v44 = vpop.permute.xlu2 %462  ;;  %v794_v40 = vmul.f32 %v791_v38, %v2183_v11 }
 0x14b   : > { %v430_v4 = vadd.f32 %v407_v41, %v380_v39  ;;  %v748_v41 = vmul.f32 %v741_v47, %v2217_v29 }
 0x14d   : > { %v480_v51 = vadd.f32 %v457_v31, %v430_v4  ;;  %v747_v31 = vmul.f32 %v741_v47, %v2201_v25 }
 0x14f   : > { %760 = vrot.lane.b32.xlu1 %v743_v52, %s1799_s26  ;;  %v506_v57 = vadd.f32 %v498_v37, %v480_v51  ;;  %v797_v52 = vmul.f32 %v791_v38, %v2201_v25  ;;  %v793_v37 = vmul.f32 %v791_v38, %v2158_v45 }
 0x150   : > { %692 = vrot.lane.b32.xlu0 %v671_v42, %s1802_s15  ;;  %696 = vrot.lane.b32.xlu2 %v673_v54, %s1802_s15  ;;  %v795_v42 = vmul.f32 %v791_v38, %v2199_v19 }
 0x151   : > { %v421_v48 = vpop.permute.xlu1 %420 }
 0x152   : > { %v413_v59 = vpop.permute.xlu0 %412  ;;  %v2177_v58 = vadd.f32 %v421_v48, %v2109_v56  ;;  %v469_v60 = vpop.permute.xlu2 %468  ;;  %v841_v48 = vstv %s1559_s4 }
 0x153   : > { %v433_v53 = vadd.f32 %v413_v59, %v383_v23 }
 0x155   : > { %v483_v62 = vadd.f32 %v463_v44, %v433_v53  ;;  %v842_v53 = vmul.f32 %v841_v48, %v2181_v61 }
 0x157   : > { %766 = vrot.lane.b32.xlu1 %v746_v1, %s1799_s26  ;;  %v509_v56 = vadd.f32 %v501_v2, %v483_v62  ;;  %v796_v62 = vmul.f32 %v791_v38, %v2179_v34  ;;  %v798_v1 = vmul.f32 %v791_v38, %v2217_v29 }
 0x158   : > { %758 = vrot.lane.b32.xlu0 %v742_v50, %s1799_s26  ;;  %762 = vrot.lane.b32.xlu2 %v744_v30, %s1799_s26 }
 0x159   : > { %v461_v8 = vpop.permute.xlu1 %460 }
 0x15a   : > { %v419_v9 = vpop.permute.xlu0 %418  ;;  %v482_v10 = vadd.f32 %v461_v8, %v2126_v14  ;;  %v535_v16 = vpop.permute.xlu2 %534  ;;  %v504_v14 = vmul.f32 %v2160_v46, %v2047_v5  ;;  %v499_v5 = vmul.f32 %v2160_v46, %v2037_v0 }
 0x15b   : > { %v436_v17 = vadd.f32 %v419_v9, %v2122_v3  ;;  %v799_v9 = vmul.f32 %v791_v38, %v2194_v15 }
 0x15c   : > { %v508_v21 = vadd.f32 %v500_v63, %v482_v10  ;;  %v843_v10 = vmul.f32 %v841_v48, %v2158_v45 }
 0x15d   : > { %v486_v22 = vadd.f32 %v469_v60, %v436_v17 }
 0x15f   : > { %772 = vrot.lane.b32.xlu1 %v749_v24, %s1799_s26  ;;  %v512_v6 = vadd.f32 %v504_v14, %v486_v22 }
 0x160   : > { %764 = vrot.lane.b32.xlu0 %v745_v26, %s1799_s26  ;;  %768 = vrot.lane.b32.xlu2 %v747_v31, %s1799_s26  ;;  %v844_v26 = vmul.f32 %v841_v48, %v2183_v11  ;;  %v846_v31 = vmul.f32 %v841_v48, %v2179_v34 }
 0x161   : > { %v467_v3 = vpop.permute.xlu1 %466 }
 0x162   : > { %v459_v32 = vpop.permute.xlu0 %458  ;;  %v485_v33 = vadd.f32 %v467_v3, %v2144_v28  ;;  %v541_v20 = vpop.permute.xlu2 %540  ;;  %v792_v28 = vmul.f32 %v791_v38, %v2181_v61  ;;  %v847_v38 = vmul.f32 %v841_v48, %v2201_v25 }
 0x163   : > { %v481_v35 = vadd.f32 %v459_v32, %v2138_v27 }
 0x164   : > { %v511_v18 = vadd.f32 %v503_v36, %v485_v33  ;;  %v891_v36 = vstv %s1560_s6 }
 0x165   : > { %v507_v39 = vadd.f32 %v499_v5, %v481_v35  ;;  %v893_v5 = vmul.f32 %v891_v36, %v2158_v45 }
 0x167   : > { %812 = vrot.lane.b32.xlu1 %v794_v40, %s1800_s5  ;;  %v557_v44 = vadd.f32 %v535_v16, %v507_v39 }
 0x168   : > { %770 = vrot.lane.b32.xlu0 %v748_v41, %s1799_s26  ;;  %808 = vrot.lane.b32.xlu2 %v792_v28, %s1800_s5 }
 0x169   : > { %v533_v0 = vpop.permute.xlu1 %532 }
 0x16a   : > { %v465_v12 = vpop.permute.xlu0 %464  ;;  %v556_v27 = vadd.f32 %v533_v0, %v506_v57  ;;  %v547_v4 = vpop.permute.xlu2 %546  ;;  %v896_v0 = vmul.f32 %v891_v36, %v2179_v34 }
 0x16b   : > { %v484_v51 = vadd.f32 %v465_v12, %v2156_v43  ;;  %v505_v43 = vmul.f32 %v2160_v46, %v2063_v13 }
 0x16d   : > { %v510_v47 = vadd.f32 %v502_v49, %v484_v51 }
 0x16f   : > { %818 = vrot.lane.b32.xlu1 %v797_v52, %s1800_s5  ;;  %v560_v54 = vadd.f32 %v541_v20, %v510_v47 }
 0x170   : > { %810 = vrot.lane.b32.xlu0 %v793_v37, %s1800_s5  ;;  %814 = vrot.lane.b32.xlu2 %v795_v42, %s1800_s5  ;;  %v899_v42 = vmul.f32 %v891_v36, %v2194_v15 }
 0x171   : > { %v539_v55 = vpop.permute.xlu1 %538 }
 0x172   : > { %v471_v57 = vpop.permute.xlu0 %470  ;;  %v559_v23 = vadd.f32 %v539_v55, %v509_v56  ;;  %v587_v7 = vpop.permute.xlu2 %586  ;;  %v895_v55 = vmul.f32 %v891_v36, %v2199_v19 }
 0x173   : > { %v487_v59 = vadd.f32 %v471_v57, %v2177_v58  ;;  %v845_v58 = vmul.f32 %v841_v48, %v2199_v19  ;;  %v897_v57 = vmul.f32 %v891_v36, %v2201_v25 }
 0x175   : > { %v513_v60 = vadd.f32 %v505_v43, %v487_v59  ;;  %v2281_v59 = vld [vmem:[#allocation2 + $0x1b] sm:$0xff] }
 0x177   : > { %858 = vrot.lane.b32.xlu1 %v842_v53, %s1801_s7  ;;  %v563_v2 = vadd.f32 %v547_v4, %v513_v60  ;;  %v894_v4 = vmul.f32 %v891_v36, %v2183_v11  ;;  %v2283_v60 = vstv %s1562_s8 }
 0x178   : > { %816 = vrot.lane.b32.xlu0 %v796_v62, %s1800_s5  ;;  %820 = vrot.lane.b32.xlu2 %v798_v1, %s1800_s5  ;;  %v2285_v62 = vld [vmem:[#allocation2 + $0x3] sm:$0xff]  ;;  %v2287_v1 = vstv %s1556_s16 }
 0x179   : > { %v545_v50 = vpop.permute.xlu1 %544 }
 0x17a   : > { %v537_v30 = vpop.permute.xlu0 %536  ;;  %v562_v56 = vadd.f32 %v545_v50, %v512_v6  ;;  %v593_v13 = vpop.permute.xlu2 %592  ;;  %v970_v50 = vmul.f32 %v2283_v60, %v2281_v59 }
 0x17b   : > { %v558_v46 = vadd.f32 %v537_v30, %v508_v21  ;;  %v848_v21 = vmul.f32 %v841_v48, %v2217_v29  ;;  %v725_v30 = vmul.f32 %v2287_v1, %v2158_v45  ;;  %v724_v45 = vmul.f32 %v2287_v1, %v2181_v61 }
 0x17d   : > { %v608_v8 = vadd.f32 %v587_v7, %v558_v46 }
 0x17f   : > { %864 = vrot.lane.b32.xlu1 %v845_v58, %s1801_s7 }
 0x180   : > { %822 = vrot.lane.b32.xlu0 %v799_v9, %s1800_s5  ;;  %860 = vrot.lane.b32.xlu2 %v843_v10, %s1801_s7 }
 0x181   : > { %v585_v16 = vpop.permute.xlu1 %584 }
 0x182   : > { %v543_v63 = vpop.permute.xlu0 %542  ;;  %v607_v17 = vadd.f32 %v585_v16, %v557_v44  ;;  %v633_v22 = vpop.permute.xlu2 %632  ;;  %v2299_v16 = vld [vmem:[#allocation2 + $0x3b] sm:$0xff] }
 0x183   : > { %v561_v24 = vadd.f32 %v543_v63, %v511_v18  ;;  %v849_v18 = vmul.f32 %v841_v48, %v2194_v15 }
 0x185   : > { %v611_v14 = vadd.f32 %v593_v13, %v561_v24  ;;  %v968_v13 = vmul.f32 %v2283_v60, %v2285_v62 }
 0x187   : > { %870 = vrot.lane.b32.xlu1 %v848_v21, %s1801_s7 }
 0x188   : > { %862 = vrot.lane.b32.xlu0 %v844_v26, %s1801_s7  ;;  %866 = vrot.lane.b32.xlu2 %v846_v31, %s1801_s7  ;;  %v728_v26 = vmul.f32 %v2287_v1, %v2179_v34  ;;  %v727_v34 = vmul.f32 %v2287_v1, %v2199_v19 }
 0x189   : > { %v591_v6 = vpop.permute.xlu1 %590 }
 0x18a   : > { %v583_v3 = vpop.permute.xlu0 %582  ;;  %v610_v32 = vadd.f32 %v591_v6, %v560_v54  ;;  %v639_v33 = vpop.permute.xlu2 %638 }
 0x18b   : > { %v606_v20 = vadd.f32 %v583_v3, %v556_v27  ;;  %v892_v27 = vmul.f32 %v891_v36, %v2181_v61 }
 0x18d   : > { %v656_v35 = vadd.f32 %v633_v22, %v606_v20  ;;  %v2305_v22 = vld [vmem:[#allocation2 + $0x23] sm:$0xff] }
 0x18e   : > { %v971_v61 = vmul.f32 %v2283_v60, %v2305_v22 }
 0x18f   : > { %910 = vrot.lane.b32.xlu1 %v893_v5, %s1802_s15 }
 0x190   : > { %868 = vrot.lane.b32.xlu0 %v847_v38, %s1801_s7  ;;  %872 = vrot.lane.b32.xlu2 %v849_v18, %s1801_s7  ;;  %v2325_v38 = vld [vmem:[#allocation2 + $0x4b] sm:$0xff] }
 0x191   : > { %v597_v39 = vpop.permute.xlu1 %596 }
 0x192   : > { %v589_v40 = vpop.permute.xlu0 %588  ;;  %v2261_v41 = vadd.f32 %v597_v39, %v563_v2  ;;  %v645_v28 = vpop.permute.xlu2 %644 }
 0x193   : > { %v609_v44 = vadd.f32 %v589_v40, %v559_v23 }
 0x195   : > { %v659_v12 = vadd.f32 %v639_v33, %v609_v44 }
 0x197   : > { %916 = vrot.lane.b32.xlu1 %v896_v0, %s1802_s15  ;;  %v974_v0 = vmul.f32 %v2283_v60, %v2325_v38 }
 0x198   : > { %908 = vrot.lane.b32.xlu0 %v892_v27, %s1802_s15  ;;  %912 = vrot.lane.b32.xlu2 %v894_v4, %s1802_s15 }
 0x199   : > { %v637_v49 = vpop.permute.xlu1 %636 }
 0x19a   : > { %v595_v51 = vpop.permute.xlu0 %594  ;;  %v2269_v47 = vadd.f32 %v637_v49, %v608_v8  ;;  %v685_v52 = vpop.permute.xlu2 %684  ;;  %v726_v49 = vmul.f32 %v2287_v1, %v2183_v11 }
 0x19b   : > { %v612_v37 = vadd.f32 %v595_v51, %v562_v56  ;;  %v898_v56 = vmul.f32 %v891_v36, %v2217_v29  ;;  %v1017_v36 = vstv %s1563_s23 }
 0x19c   : > { %v1018_v40 = vmul.f32 %v1017_v36, %v2285_v62 }
 0x19d   : > { %v2272_v54 = vadd.f32 %v645_v28, %v612_v37  ;;  %v731_v28 = vmul.f32 %v2287_v1, %v2194_v15  ;;  %v730_v15 = vmul.f32 %v2287_v1, %v2217_v29 }
 0x19f   : > { %922 = vrot.lane.b32.xlu1 %v899_v42, %s1802_s15 }
 0x1a0   : > { %914 = vrot.lane.b32.xlu0 %v895_v55, %s1802_s15  ;;  %918 = vrot.lane.b32.xlu2 %v897_v57, %s1802_s15  ;;  %v1021_v55 = vmul.f32 %v1017_v36, %v2305_v22 }
 0x1a1   : > { %v643_v23 = vpop.permute.xlu1 %642 }
 0x1a2   : > { %v635_v7 = vpop.permute.xlu0 %634  ;;  %v2279_v48 = vadd.f32 %v643_v23, %v611_v14  ;;  %v691_v43 = vpop.permute.xlu2 %690  ;;  %v973_v14 = vmul.f32 %v2283_v60, %v2299_v16 }
 0x1a3   : > { %v657_v53 = vadd.f32 %v635_v7, %v607_v17  ;;  %v2303_v17 = vld [vmem:[#allocation2 + $0xb] sm:$0xff] }
 0x1a4   : > { %v969_v31 = vmul.f32 %v2283_v60, %v2303_v17 }
 0x1a5   : > { %v707_v2 = vadd.f32 %v685_v52, %v657_v53  ;;  %v2343_v52 = vld [vmem:[#allocation2 + $0x53] sm:$0xff] }
 0x1a6   : > { %v975_v57 = vmul.f32 %v2283_v60, %v2343_v52 }
 0x1a7   : > { %988 = vrot.lane.b32.xlu1 %v970_v50, %s1799_s26  ;;  %v733_v46 = vadd.f32 %v725_v30, %v707_v2  ;;  %v1024_v2 = vmul.f32 %v1017_v36, %v2325_v38  ;;  %v1020_v50 = vmul.f32 %v1017_v36, %v2281_v59 }
 0x1a8   : > { %920 = vrot.lane.b32.xlu0 %v898_v56, %s1802_s15  ;;  %984 = vrot.lane.b32.xlu2 %v968_v13, %s1799_s26 }
 0x1a9   : > { %v683_v58 = vpop.permute.xlu1 %682 }
 0x1aa   : > { %v641_v8 = vpop.permute.xlu0 %640  ;;  %v706_v9 = vadd.f32 %v683_v58, %v656_v35  ;;  %v697_v10 = vpop.permute.xlu2 %696  ;;  %v2323_v35 = vld [vmem:[#allocation2 + $0x33] sm:$0xff] }
 0x1ab   : > { %v660_v63 = vadd.f32 %v641_v8, %v610_v32  ;;  %v972_v44 = vmul.f32 %v2283_v60, %v2323_v35  ;;  %v1022_v30 = vmul.f32 %v1017_v36, %v2323_v35 }
 0x1ac   : > { %v2307_v24 = vadd.f32 %v724_v45, %v706_v9  ;;  %v1025_v45 = vmul.f32 %v1017_v36, %v2343_v52 }
 0x1ad   : > { %v710_v21 = vadd.f32 %v691_v43, %v660_v63  ;;  %v729_v43 = vmul.f32 %v2287_v1, %v2201_v25  ;;  %v1067_v1 = vstv %s1564_s24 }
 0x1ae   : > { %v1069_v8 = vmul.f32 %v1067_v1, %v2303_v17 }
 0x1af   : > { %994 = vrot.lane.b32.xlu1 %v973_v14, %s1799_s26  ;;  %v736_v6 = vadd.f32 %v728_v26, %v710_v21 }
 0x1b0   : > { %986 = vrot.lane.b32.xlu0 %v969_v31, %s1799_s26  ;;  %990 = vrot.lane.b32.xlu2 %v971_v61, %s1799_s26 }
 0x1b1   : > { %v689_v3 = vpop.permute.xlu1 %688 }
 0x1b2   : > { %v647_v32 = vpop.permute.xlu0 %646  ;;  %v709_v33 = vadd.f32 %v689_v3, %v659_v12  ;;  %v763_v20 = vpop.permute.xlu2 %762  ;;  %v1070_v3 = vmul.f32 %v1067_v1, %v2281_v59 }
 0x1b3   : > { %v663_v5 = vadd.f32 %v647_v32, %v2261_v41 }
 0x1b4   : > { %v735_v18 = vadd.f32 %v727_v34, %v709_v33 }
 0x1b5   : > { %v713_v39 = vadd.f32 %v697_v10, %v663_v5  ;;  %v1023_v10 = vmul.f32 %v1017_v36, %v2299_v16  ;;  %v1075_v5 = vmul.f32 %v1067_v1, %v2343_v52 }
 0x1b7   : > { %1034 = vrot.lane.b32.xlu1 %v1018_v40, %s1800_s5  ;;  %v739_v19 = vadd.f32 %v731_v28, %v713_v39  ;;  %v1071_v39 = vmul.f32 %v1067_v1, %v2305_v22  ;;  %v1073_v40 = vmul.f32 %v1067_v1, %v2299_v16 }
 0x1b8   : > { %992 = vrot.lane.b32.xlu0 %v972_v44, %s1799_s26  ;;  %996 = vrot.lane.b32.xlu2 %v974_v0, %s1799_s26 }
 0x1b9   : > { %v695_v41 = vpop.permute.xlu1 %694 }
 0x1ba   : > { %v687_v12 = vpop.permute.xlu0 %686  ;;  %v712_v27 = vadd.f32 %v695_v41, %v2272_v54  ;;  %v769_v4 = vpop.permute.xlu2 %768  ;;  %v1019_v54 = vmul.f32 %v1017_v36, %v2303_v17  ;;  %v1117_v41 = vstv %s1565_s25 }
 0x1bb   : > { %v708_v51 = vadd.f32 %v687_v12, %v2269_v47 }
 0x1bc   : > { %v738_v37 = vadd.f32 %v730_v15, %v712_v27  ;;  %v1120_v27 = vmul.f32 %v1117_v41, %v2281_v59  ;;  %v1074_v15 = vmul.f32 %v1067_v1, %v2325_v38 }
 0x1bd   : > { %v734_v42 = vadd.f32 %v726_v49, %v708_v51  ;;  %v1118_v49 = vmul.f32 %v1117_v41, %v2285_v62 }
 0x1bf   : > { %1040 = vrot.lane.b32.xlu1 %v1021_v55, %s1800_s5  ;;  %v784_v23 = vadd.f32 %v763_v20, %v734_v42 }
 0x1c0   : > { %998 = vrot.lane.b32.xlu0 %v975_v57, %s1799_s26  ;;  %1036 = vrot.lane.b32.xlu2 %v1019_v54, %s1800_s5  ;;  %v1123_v54 = vmul.f32 %v1117_v41, %v2299_v16 }
 0x1c1   : > { %v761_v11 = vpop.permute.xlu1 %760 }
 0x1c2   : > { %v693_v29 = vpop.permute.xlu0 %692  ;;  %v783_v47 = vadd.f32 %v761_v11, %v733_v46  ;;  %v809_v7 = vpop.permute.xlu2 %808  ;;  %v1119_v11 = vmul.f32 %v1117_v41, %v2303_v17 }
 0x1c3   : > { %v711_v53 = vadd.f32 %v693_v29, %v2279_v48  ;;  %v1121_v29 = vmul.f32 %v1117_v41, %v2305_v22 }
 0x1c5   : > { %v737_v60 = vadd.f32 %v729_v43, %v711_v53 }
 0x1c7   : > { %1046 = vrot.lane.b32.xlu1 %v1024_v2, %s1800_s5  ;;  %v787_v56 = vadd.f32 %v769_v4, %v737_v60  ;;  %v2398_v60 = vld [vmem:[#allocation2 + $0x4] sm:$0xff]  ;;  %v1193_v2 = vstv %s1567_s30 }
 0x1c8   : > { %1038 = vrot.lane.b32.xlu0 %v1020_v50, %s1800_s5  ;;  %1042 = vrot.lane.b32.xlu2 %v1022_v30, %s1800_s5  ;;  %v1194_v30 = vmul.f32 %v1193_v2, %v2398_v60 }
 0x1c9   : > { %v767_v13 = vpop.permute.xlu1 %766 }
 0x1ca   : > { %v759_v46 = vpop.permute.xlu0 %758  ;;  %v786_v58 = vadd.f32 %v767_v13, %v736_v6  ;;  %v815_v25 = vpop.permute.xlu2 %814  ;;  %v1068_v6 = vmul.f32 %v1067_v1, %v2285_v62  ;;  %v1122_v13 = vmul.f32 %v1117_v41, %v2323_v35 }
 0x1cb   : > { %v782_v48 = vadd.f32 %v759_v46, %v2307_v24  ;;  %v1072_v24 = vmul.f32 %v1067_v1, %v2323_v35  ;;  %v1124_v46 = vmul.f32 %v1117_v41, %v2325_v38 }
 0x1cd   : > { %v832_v9 = vadd.f32 %v809_v7, %v782_v48 }
 0x1cf   : > { %1086 = vrot.lane.b32.xlu1 %v1069_v8, %s1801_s7  ;;  %v2410_v8 = vld [vmem:[#allocation2 + $0x24] sm:$0xff] }
 0x1d0   : > { %1044 = vrot.lane.b32.xlu0 %v1023_v10, %s1800_s5  ;;  %1048 = vrot.lane.b32.xlu2 %v1025_v45, %s1800_s5  ;;  %v2414_v45 = vld [vmem:[#allocation2 + $0xc] sm:$0xff] }
 0x1d1   : > { %v773_v63 = vpop.permute.xlu1 %772 }
 0x1d2   : > { %v765_v21 = vpop.permute.xlu0 %764  ;;  %v789_v14 = vadd.f32 %v773_v63, %v739_v19  ;;  %v821_v26 = vpop.permute.xlu2 %820 }
 0x1d3   : > { %v785_v31 = vadd.f32 %v765_v21, %v735_v18  ;;  %v1197_v21 = vmul.f32 %v1193_v2, %v2410_v8 }
 0x1d5   : > { %v835_v61 = vadd.f32 %v815_v25, %v785_v31  ;;  %v1195_v31 = vmul.f32 %v1193_v2, %v2414_v45 }
 0x1d7   : > { %1092 = vrot.lane.b32.xlu1 %v1072_v24, %s1801_s7 }
 0x1d8   : > { %1084 = vrot.lane.b32.xlu0 %v1068_v6, %s1801_s7  ;;  %1088 = vrot.lane.b32.xlu2 %v1070_v3, %s1801_s7 }
 0x1d9   : > { %v813_v32 = vpop.permute.xlu1 %812 }
 0x1da   : > { %v771_v33 = vpop.permute.xlu0 %770  ;;  %v834_v20 = vadd.f32 %v813_v32, %v784_v23  ;;  %v861_v36 = vpop.permute.xlu2 %860 }
 0x1db   : > { %v788_v34 = vadd.f32 %v771_v33, %v738_v37  ;;  %v2424_v33 = vld [vmem:[#allocation2 + $0x4c] sm:$0xff] }
 0x1dd   : > { %v838_v18 = vadd.f32 %v821_v26, %v788_v34  ;;  %v1125_v26 = vmul.f32 %v1117_v41, %v2343_v52  ;;  %v2431_v34 = vld [vmem:[#allocation2 + $0x34] sm:$0xff] }
 0x1df   : > { %1098 = vrot.lane.b32.xlu1 %v1075_v5, %s1801_s7 }
 0x1e0   : > { %1090 = vrot.lane.b32.xlu0 %v1071_v39, %s1801_s7  ;;  %1094 = vrot.lane.b32.xlu2 %v1073_v40, %s1801_s7  ;;  %v1200_v39 = vmul.f32 %v1193_v2, %v2424_v33 }
 0x1e1   : > { %v819_v28 = vpop.permute.xlu1 %818 }
 0x1e2   : > { %v811_v44 = vpop.permute.xlu0 %810  ;;  %v2380_v0 = vadd.f32 %v819_v28, %v787_v56  ;;  %v867_v19 = vpop.permute.xlu2 %866 }
 0x1e3   : > { %v833_v12 = vadd.f32 %v811_v44, %v783_v47  ;;  %v1198_v44 = vmul.f32 %v1193_v2, %v2431_v34 }
 0x1e5   : > { %v883_v4 = vadd.f32 %v861_v36, %v833_v12  ;;  %v2429_v36 = vld [vmem:[#allocation2 + $0x1c] sm:$0xff] }
 0x1e6   : > { %v1196_v28 = vmul.f32 %v1193_v2, %v2429_v36 }
 0x1e7   : > { %1138 = vrot.lane.b32.xlu1 %v1120_v27, %s1802_s15  ;;  %v1243_v27 = vstv %s1568_s18 }
 0x1e8   : > { %1096 = vrot.lane.b32.xlu0 %v1074_v15, %s1801_s7  ;;  %1134 = vrot.lane.b32.xlu2 %v1118_v49, %s1802_s15  ;;  %v2448_v49 = vld [vmem:[#allocation2 + $0x3c] sm:$0xff] }
 0x1e9   : > { %v859_v51 = vpop.permute.xlu1 %858 }
 0x1ea   : > { %v817_v37 = vpop.permute.xlu0 %816  ;;  %v2388_v42 = vadd.f32 %v859_v51, %v832_v9  ;;  %v873_v55 = vpop.permute.xlu2 %872  ;;  %v2412_v9 = vstv %s1561_s3  ;;  %v2450_v51 = vld [vmem:[#allocation2 + $0x54] sm:$0xff]  ;;  %s1726_s3 = scalar_lea.hbm %s2615_s2, 128 }
 0x1eb   : > { %v836_v57 = vadd.f32 %v817_v37, %v786_v58  ;;  %v955_v40 = vmul.f32 %v2412_v9, %v2299_v16  ;;  %v950_v16 = vmul.f32 %v2412_v9, %v2285_v62 }
 0x1ed   : > { %v886_v23 = vadd.f32 %v867_v19, %v836_v57  ;;  %v1245_v57 = vmul.f32 %v1243_v27, %v2414_v45 }
 0x1ef   : > { %1144 = vrot.lane.b32.xlu1 %v1123_v54, %s1802_s15  ;;  %v1199_v54 = vmul.f32 %v1193_v2, %v2448_v49 }
 0x1f0   : > { %1136 = vrot.lane.b32.xlu0 %v1119_v11, %s1802_s15  ;;  %1140 = vrot.lane.b32.xlu2 %v1121_v29, %s1802_s15 }
 0x1f1   : > { %v865_v47 = vpop.permute.xlu1 %864 }
 0x1f2   : > { %v823_v7 = vpop.permute.xlu0 %822  ;;  %v2396_v43 = vadd.f32 %v865_v47, %v835_v61  ;;  %v913_v53 = vpop.permute.xlu2 %912  ;;  %v957_v47 = vmul.f32 %v2412_v9, %v2343_v52 }
 0x1f3   : > { %v839_v50 = vadd.f32 %v823_v7, %v789_v14  ;;  %v952_v14 = vmul.f32 %v2412_v9, %v2281_v59  ;;  %v951_v59 = vmul.f32 %v2412_v9, %v2303_v17  ;;  %v953_v7 = vmul.f32 %v2412_v9, %v2305_v22 }
 0x1f5   : > { %v2401_v56 = vadd.f32 %v873_v55, %v839_v50 }
 0x1f7   : > { %1210 = vrot.lane.b32.xlu1 %v1194_v30, %s1799_s26  ;;  %v1248_v30 = vmul.f32 %v1243_v27, %v2431_v34 }
 0x1f8   : > { %1142 = vrot.lane.b32.xlu0 %v1122_v13, %s1802_s15  ;;  %1146 = vrot.lane.b32.xlu2 %v1124_v46, %s1802_s15  ;;  %v1244_v13 = vmul.f32 %v1243_v27, %v2398_v60  ;;  %v1246_v46 = vmul.f32 %v1243_v27, %v2429_v36 }
 0x1f9   : > { %v871_v58 = vpop.permute.xlu1 %870 }
 0x1fa   : > { %v863_v25 = vpop.permute.xlu0 %862  ;;  %v2408_v1 = vadd.f32 %v871_v58, %v838_v18  ;;  %v919_v48 = vpop.permute.xlu2 %918 }
 0x1fb   : > { %v884_v10 = vadd.f32 %v863_v25, %v834_v20 }
 0x1fd   : > { %v934_v63 = vadd.f32 %v913_v53, %v884_v10 }
 0x1ff   : > { %1216 = vrot.lane.b32.xlu1 %v1197_v21, %s1799_s26  ;;  %v960_v24 = vadd.f32 %v952_v14, %v934_v63  ;;  %v1251_v63 = vmul.f32 %v1243_v27, %v2450_v51  ;;  %v1247_v21 = vmul.f32 %v1243_v27, %v2410_v8  ;;  %v1249_v14 = vmul.f32 %v1243_v27, %v2448_v49 }
 0x200   : > { %1148 = vrot.lane.b32.xlu0 %v1125_v26, %s1802_s15  ;;  %1212 = vrot.lane.b32.xlu2 %v1195_v31, %s1799_s26 }
 0x201   : > { %v911_v61 = vpop.permute.xlu1 %910 }
 0x202   : > { %v869_v6 = vpop.permute.xlu0 %868  ;;  %v933_v3 = vadd.f32 %v911_v61, %v883_v4  ;;  %v985_v32 = vpop.permute.xlu2 %984  ;;  %v954_v4 = vmul.f32 %v2412_v9, %v2323_v35 }
 0x203   : > { %v887_v20 = vadd.f32 %v869_v6, %v2380_v0 }
 0x204   : > { %v2433_v5 = vadd.f32 %v951_v59, %v933_v3 }
 0x205   : > { %v937_v18 = vadd.f32 %v919_v48, %v887_v20 }
 0x207   : > { %1222 = vrot.lane.b32.xlu1 %v1200_v39, %s1799_s26  ;;  %v963_v17 = vadd.f32 %v955_v40, %v937_v18 }
 0x208   : > { %1214 = vrot.lane.b32.xlu0 %v1196_v28, %s1799_s26  ;;  %1218 = vrot.lane.b32.xlu2 %v1198_v44, %s1799_s26 }
 0x209   : > { %v917_v0 = vpop.permute.xlu1 %916 }
 0x20a   : > { %v909_v19 = vpop.permute.xlu0 %908  ;;  %v936_v41 = vadd.f32 %v917_v0, %v886_v23  ;;  %v991_v12 = vpop.permute.xlu2 %990  ;;  %v1201_v23 = vmul.f32 %v1193_v2, %v2450_v51 }
 0x20b   : > { %v932_v15 = vadd.f32 %v909_v19, %v2388_v42 }
 0x20c   : > { %v962_v37 = vadd.f32 %v954_v4, %v936_v41  ;;  %v1343_v4 = vstv %s1570_s20 }
 0x20d   : > { %v958_v55 = vadd.f32 %v950_v16, %v932_v15  ;;  %v1344_v15 = vmul.f32 %v1343_v4, %v2398_v60 }
 0x20f   : > { %1262 = vrot.lane.b32.xlu1 %v1245_v57, %s1800_s5  ;;  %v1008_v35 = vadd.f32 %v985_v32, %v958_v55  ;;  %v1250_v32 = vmul.f32 %v1243_v27, %v2424_v33 }
 0x210   : > { %1220 = vrot.lane.b32.xlu0 %v1199_v54, %s1799_s26  ;;  %1224 = vrot.lane.b32.xlu2 %v1201_v23, %s1799_s26  ;;  %s1569_s26 = sld [smem:[#allocation3 + $0x17]] }
 0x211   : > { %v923_v62 = vpop.permute.xlu1 %922 }
 0x212   : > { %v915_v42 = vpop.permute.xlu0 %914  ;;  %v939_v11 = vadd.f32 %v923_v62, %v2401_v56  ;;  %v997_v29 = vpop.permute.xlu2 %996 }
 0x213   : > { %v935_v53 = vadd.f32 %v915_v42, %v2396_v43  ;;  %v956_v43 = vmul.f32 %v2412_v9, %v2325_v38 }
 0x214   : > { %v965_v2 = vadd.f32 %v957_v47, %v939_v11  ;;  %v1347_v11 = vmul.f32 %v1343_v4, %v2410_v8 }
 0x215   : > { %v961_v50 = vadd.f32 %v953_v7, %v935_v53  ;;  %v1345_v7 = vmul.f32 %v1343_v4, %v2414_v45 }
 0x216   : > { %v1293_v9 = vstv %s1569_s26 }
 0x217   : > { %1268 = vrot.lane.b32.xlu1 %v1248_v30, %s1800_s5  ;;  %v1011_v56 = vadd.f32 %v991_v12, %v961_v50  ;;  %v1296_v6 = vmul.f32 %v1293_v9, %v2429_v36  ;;  %v1294_v59 = vmul.f32 %v1293_v9, %v2398_v60  ;;  %v1297_v0 = vmul.f32 %v1293_v9, %v2410_v8 }
 0x218   : > { %1260 = vrot.lane.b32.xlu0 %v1244_v13, %s1800_s5  ;;  %1264 = vrot.lane.b32.xlu2 %v1246_v46, %s1800_s5  ;;  %v1298_v55 = vmul.f32 %v1293_v9, %v2431_v34  ;;  %v1300_v57 = vmul.f32 %v1293_v9, %v2424_v33  ;;  %v1301_v47 = vmul.f32 %v1293_v9, %v2450_v51 }
 0x219   : > { %v989_v52 = vpop.permute.xlu1 %988  ;;  %v1350_v46 = vmul.f32 %v1343_v4, %v2424_v33 }
 0x21a   : > { %v921_v58 = vpop.permute.xlu0 %920  ;;  %v1010_v22 = vadd.f32 %v989_v52, %v960_v24  ;;  %v1037_v25 = vpop.permute.xlu2 %1036  ;;  %v1346_v52 = vmul.f32 %v1343_v4, %v2429_v36 }
 0x21b   : > { %v938_v48 = vadd.f32 %v921_v58, %v2408_v1  ;;  %v1348_v58 = vmul.f32 %v1343_v4, %v2431_v34 }
 0x21d   : > { %v964_v10 = vadd.f32 %v956_v43, %v938_v48 }
 0x21f   : > { %1274 = vrot.lane.b32.xlu1 %v1251_v63, %s1800_s5  ;;  %v1014_v26 = vadd.f32 %v997_v29, %v964_v10 }
 0x220   : > { %1266 = vrot.lane.b32.xlu0 %v1247_v21, %s1800_s5  ;;  %1270 = vrot.lane.b32.xlu2 %v1249_v14, %s1800_s5 }
 0x221   : > { %v995_v31 = vpop.permute.xlu1 %994 }
 0x222   : > { %v987_v24 = vpop.permute.xlu0 %986  ;;  %v1013_v61 = vadd.f32 %v995_v31, %v963_v17  ;;  %v1043_v38 = vpop.permute.xlu2 %1042  ;;  %v1295_v17 = vmul.f32 %v1293_v9, %v2414_v45  ;;  %v1351_v31 = vmul.f32 %v1343_v4, %v2450_v51 }
 0x223   : > { %v1009_v1 = vadd.f32 %v987_v24, %v2433_v5  ;;  %v1299_v5 = vmul.f32 %v1293_v9, %v2448_v49 }
 0x225   : > { %v1059_v3 = vadd.f32 %v1037_v25, %v1009_v1 }
 0x227   : > { %1314 = vrot.lane.b32.xlu1 %v1296_v6, %s1801_s7 }
 0x228   : > { %1272 = vrot.lane.b32.xlu0 %v1250_v32, %s1800_s5  ;;  %1310 = vrot.lane.b32.xlu2 %v1294_v59, %s1801_s7  ;;  %s1566_s5 = sld [smem:[#allocation3 + $0x14]] }
 0x229   : > { %v1035_v20 = vpop.permute.xlu1 %1034 }
 0x22a   : > { %v993_v18 = vpop.permute.xlu0 %992  ;;  %v1058_v39 = vadd.f32 %v1035_v20, %v1008_v35  ;;  %v1049_v40 = vpop.permute.xlu2 %1048 }
 0x22b   : > { %v1012_v28 = vadd.f32 %v993_v18, %v962_v37 }
 0x22d   : > { %v1062_v44 = vadd.f32 %v1043_v38, %v1012_v28 }
 0x22e   : > { %v1175_v10 = vstv %s1566_s5 }
 0x22f   : > { %1320 = vrot.lane.b32.xlu1 %v1299_v5, %s1801_s7  ;;  %v1176_v14 = vmul.f32 %v1175_v10, %v2398_v60  ;;  %v1179_v32 = vmul.f32 %v1175_v10, %v2410_v8 }
 0x230   : > { %1312 = vrot.lane.b32.xlu0 %v1295_v17, %s1801_s7  ;;  %1316 = vrot.lane.b32.xlu2 %v1297_v0, %s1801_s7  ;;  %v1182_v17 = vmul.f32 %v1175_v10, %v2424_v33 }
 0x231   : > { %v1041_v19 = vpop.permute.xlu1 %1040 }
 0x232   : > { %v999_v41 = vpop.permute.xlu0 %998  ;;  %v1061_v12 = vadd.f32 %v1041_v19, %v1011_v56  ;;  %v1089_v27 = vpop.permute.xlu2 %1088 }
 0x233   : > { %v1015_v16 = vadd.f32 %v999_v41, %v965_v2 }
 0x235   : > { %v1065_v37 = vadd.f32 %v1049_v40, %v1015_v16  ;;  %v1178_v40 = vmul.f32 %v1175_v10, %v2429_v36 }
 0x237   : > { %1360 = vrot.lane.b32.xlu1 %v1344_v15, %s1802_s15 }
 0x238   : > { %1318 = vrot.lane.b32.xlu0 %v1298_v55, %s1801_s7  ;;  %1322 = vrot.lane.b32.xlu2 %v1300_v57, %s1801_s7 }
 0x239   : > { %v1047_v54 = vpop.permute.xlu1 %1046 }
 0x23a   : > { %v1039_v23 = vpop.permute.xlu0 %1038  ;;  %v1064_v35 = vadd.f32 %v1047_v54, %v1014_v26  ;;  %v1095_v62 = vpop.permute.xlu2 %1094  ;;  %v1349_v26 = vmul.f32 %v1343_v4, %v2448_v49  ;;  %v1177_v4 = vmul.f32 %v1175_v10, %v2414_v45  ;;  %v1180_v54 = vmul.f32 %v1175_v10, %v2431_v34 }
 0x23b   : > { %v1060_v42 = vadd.f32 %v1039_v23, %v1010_v22 }
 0x23d   : > { %v1110_v29 = vadd.f32 %v1089_v27, %v1060_v42  ;;  %v1181_v27 = vmul.f32 %v1175_v10, %v2448_v49 }
 0x23f   : > { %1366 = vrot.lane.b32.xlu1 %v1347_v11, %s1802_s15  ;;  %v1183_v11 = vmul.f32 %v1175_v10, %v2450_v51 }
 0x240   : > { %1324 = vrot.lane.b32.xlu0 %v1301_v47, %s1801_s7  ;;  %1362 = vrot.lane.b32.xlu2 %v1345_v7, %s1802_s15  ;;  %s2541_s7 = scalar_lea.vmem [#allocation8], %s1545_s29  ;;  %s1577_s29 = sshll.u32 %s1784_s12, 6 }
 0x241   : > { %v1087_v53 = vpop.permute.xlu1 %1086  ;;  %s1432_s6 = scalar_lea.hbm %s2615_s2, %s1577_s29  ;;  %s1433_s8 = sshll.u32 %s2541_s7, 4  ;;  %s1434_s8 = int_to_ptr.vmem [resolvable:$true] %s1433_s8 }
 0x242   : > { %v1045_v2 = vpop.permute.xlu0 %1044  ;;  %v1109_v50 = vadd.f32 %v1087_v53, %v1059_v3  ;;  %v1135_v30 = vpop.permute.xlu2 %1134  ;;  %s1435_s16 = sshll.u32 %s1432_s6, 4  ;;  %s1418_s12 = scalar_lea.sflag [#allocation5], %s1925_s17  ;;  %s1436_s16 = int_to_ptr.hbm [resolvable:$true] %s1435_s16 }
 0x243   : > { %v1063_v13 = vadd.f32 %v1045_v2, %v1013_v61  ;;  %s1720_s23 = sshra.s32 %s1436_s16, 4  ;;  %s1721_s23 = int_to_ptr.hbm [resolvable:$true] %s1720_s23 }
 0x244   : > { %s1722_s24 = scalar_lea.hbm %s1721_s23, 64  ;;  %p1727_p11 = scmp.lt.s32.totalorder %s1721_s23, %s2615_s2 }
 0x245   : > { %v1113_v56 = vadd.f32 %v1095_v62, %v1063_v13  ;;  %p1723_p3 = scmp.ne.s32.totalorder %s1721_s23, %s1722_s24  ;;  %p1728_p12 = scmp.lt.s32.totalorder %s1726_s3, %s1722_s24 }
 0x247   : > { %1372 = vrot.lane.b32.xlu1 %v1350_v46, %s1802_s15  ;;  %p1724_p5 = pnand %p1723_p3, %p1872_p8  ;;  %p1729_p0 = por %p1728_p12, %p1727_p11 }
 0x248   : > { %1364 = vrot.lane.b32.xlu0 %v1346_v52, %s1802_s15  ;;  %1368 = vrot.lane.b32.xlu2 %v1348_v58, %s1802_s15 }
 0x249   : > { %v1093_v22 = vpop.permute.xlu1 %1092  ;;  %p1725_p7 = pneg %p1724_p5 }
 0x24a   : > { %v1085_v25 = vpop.permute.xlu0 %1084  ;;  %v1112_v43 = vadd.f32 %v1093_v22, %v1062_v44  ;;  %v1141_v48 = vpop.permute.xlu2 %1140 }
 0x24b   : > { %v1108_v63 = vadd.f32 %v1085_v25, %v1058_v39  ;;  %p1730_p1 = pnand %p1729_p0, %p1725_p7 }
 0x24d   : > { %v1158_v21 = vadd.f32 %v1135_v30, %v1108_v63 }
 0x24f   : > { %v1184_v24 = vadd.f32 %v1176_v14, %v1158_v21 }
 0x250   : > { %1370 = vrot.lane.b32.xlu0 %v1349_v26, %s1802_s15  ;;  %1374 = vrot.lane.b32.xlu2 %v1351_v31, %s1802_s15  ;;  %v1393_v26 = vld [vmem:[%s1931_s27 + $0x8] sm:$0xff] }
 0x251   : > { %v1099_v61 = vpop.permute.xlu1 %1098 }
 0x252   : > { %v1091_v38 = vpop.permute.xlu0 %1090  ;;  %v1115_v9 = vadd.f32 %v1099_v61, %v1065_v37  ;;  %v1147_v1 = vpop.permute.xlu2 %1146 }
 0x253   : > { %v1111_v6 = vadd.f32 %v1091_v38, %v1061_v12 }
 0x255   : > { %v1161_v3 = vadd.f32 %v1141_v48, %v1111_v6  ;;  %v1392_v6 = vld [vmem:[%s1931_s27] sm:$0xff] }
 0x257   : > { %v2516_v59 = vadd.f32 %v1179_v32, %v1161_v3 }
 0x259   : > { %v1139_v60 = vpop.permute.xlu1 %1138 }
 0x25a   : > { %v1097_v20 = vpop.permute.xlu0 %1096  ;;  %v1160_v18 = vadd.f32 %v1139_v60, %v1110_v29  ;;  %v1213_v39 = vpop.permute.xlu2 %1212 }
 0x25b   : > { %v1114_v28 = vadd.f32 %v1097_v20, %v1064_v35 }
 0x25c   : > { %v2519_v5 = vadd.f32 %v1178_v40, %v1160_v18  ;;  %v1396_v40 = vld [vmem:[%s1931_s27 + $0x20] sm:$0xff] }
 0x25d   : > { %v1164_v44 = vadd.f32 %v1147_v1, %v1114_v28 }
 0x25f   : > { %v2522_v0 = vadd.f32 %v1182_v17, %v1164_v44 }
 0x261   : > { %v1145_v19 = vpop.permute.xlu1 %1144 }
 0x262   : > { %v1137_v41 = vpop.permute.xlu0 %1136  ;;  %v1163_v12 = vadd.f32 %v1145_v19, %v1113_v56  ;;  %v1219_v8 = vpop.permute.xlu2 %1218 }
 0x263   : > { %v1159_v16 = vadd.f32 %v1137_v41, %v1109_v50 }
 0x264   : > { %v2526_v15 = vadd.f32 %v1181_v27, %v1163_v12 }
 0x265   : > { %v1185_v36 = vadd.f32 %v1177_v4, %v1159_v16 }
 0x267   : > { %v1235_v51 = vadd.f32 %v1213_v39, %v1185_v36 }
 0x269   : > { %v1211_v37 = vpop.permute.xlu1 %1210 }
 0x26a   : > { %v1143_v55 = vpop.permute.xlu0 %1142  ;;  %v1225_v57 = vpop.permute.xlu2 %1224  ;;  %v1234_v10 = vadd.f32 %v1211_v37, %v1184_v24 }
 0x26b   : > { %v1162_v33 = vadd.f32 %v1143_v55, %v1112_v43 }
 0x26d   : > { %v1188_v23 = vadd.f32 %v1180_v54, %v1162_v33  ;;  %v1399_v54 = vld [vmem:[%s1931_s27 + $0x38] sm:$0xff] }
 0x26f   : > { %v1238_v61 = vadd.f32 %v1219_v8, %v1188_v23  ;;  %v1395_v8 = vld [vmem:[%s1931_s27 + $0x18] sm:$0xff] }
 0x271   : > { %v1217_v35 = vpop.permute.xlu1 %1216 }
 0x272   : > { %v1149_v62 = vpop.permute.xlu0 %1148  ;;  %v2529_v42 = vpop.permute.xlu2 %1264  ;;  %v1237_v3 = vadd.f32 %v1217_v35, %v2516_v59 }
 0x273   : > { %v1165_v49 = vadd.f32 %v1149_v62, %v1115_v9 }
 0x275   : > { %v1191_v29 = vadd.f32 %v1183_v11, %v1165_v49 }
 0x277   : > { %v1241_v17 = vadd.f32 %v1225_v57, %v1191_v29  ;;  %v1394_v29 = vld [vmem:[%s1931_s27 + $0x10] sm:$0xff] }
 0x279   : > { %v1223_v45 = vpop.permute.xlu1 %1222 }
 0x27a   : > { %v1215_v47 = vpop.permute.xlu0 %1214  ;;  %v2532_v7 = vpop.permute.xlu2 %1270  ;;  %v1240_v27 = vadd.f32 %v1223_v45, %v2522_v0 }
 0x27b   : > { %v1236_v36 = vadd.f32 %v1215_v47, %v2519_v5  ;;  %v1398_v5 = vld [vmem:[%s1931_s27 + $0x30] sm:$0xff] }
 0x27d   : > { %v1286_v35 = vadd.f32 %v2529_v42, %v1236_v36 }
 0x281   : > { %v1263_v53 = vpop.permute.xlu1 %1262 }
 0x282   : > { %v2534_v2 = vpop.permute.xlu0 %1220  ;;  %v1311_v50 = vpop.permute.xlu2 %1310  ;;  %v1285_v43 = vadd.f32 %v1263_v53, %v1235_v51 }
 0x283   : > { %v1239_v53 = vadd.f32 %v2534_v2, %v2526_v15  ;;  %v1397_v15 = vld [vmem:[%s1931_s27 + $0x28] sm:$0xff] }
 0x289   : > { %v1269_v30 = vpop.permute.xlu1 %1268 }
 0x28a   : > { %v1261_v34 = vpop.permute.xlu0 %1260  ;;  %v1317_v13 = vpop.permute.xlu2 %1316  ;;  %v1288_v1 = vadd.f32 %v1269_v30, %v1238_v61 }
 0x28b   : > { %v1284_v14 = vadd.f32 %v1261_v34, %v1234_v10  ;;  %v1289_v34 = vadd.f32 %v2532_v7, %v1239_v53 }
 0x28d   : > { %v1334_v9 = vadd.f32 %v1311_v50, %v1284_v14 }
 0x291   : > { %v1275_v46 = vpop.permute.xlu1 %1274 }
 0x292   : > { %v1267_v56 = vpop.permute.xlu0 %1266  ;;  %v1323_v52 = vpop.permute.xlu2 %1322  ;;  %v1291_v12 = vadd.f32 %v1275_v46, %v1241_v17 }
 0x293   : > { %v1287_v39 = vadd.f32 %v1267_v56, %v1237_v3 }
 0x295   : > { %v1337_v41 = vadd.f32 %v1317_v13, %v1287_v39 }
 0x299   : > { %v1315_v58 = vpop.permute.xlu1 %1314 }
 0x29a   : > { %v1273_v22 = vpop.permute.xlu0 %1272  ;;  %v1363_v25 = vpop.permute.xlu2 %1362  ;;  %v1336_v11 = vadd.f32 %v1315_v58, %v1286_v35 }
 0x29b   : > { %v1290_v55 = vadd.f32 %v1273_v22, %v1240_v27 }
 0x29d   : > { %v1340_v0 = vadd.f32 %v1323_v52, %v1290_v55 }
 0x2a1   : > { %v2536_v48 = vpop.permute.xlu1 %1320 }
 0x2a2   : > { %v1313_v63 = vpop.permute.xlu0 %1312  ;;  %v1369_v32 = vpop.permute.xlu2 %1368  ;;  %v1339_v13 = vadd.f32 %v2536_v48, %v1289_v34 }
 0x2a3   : > { %v1335_v21 = vadd.f32 %v1313_v63, %v1285_v43 }
 0x2a5   : > { %v1385_v31 = vadd.f32 %v1363_v25, %v1335_v21 }
 0x2a7   : > { %v1401_v38 = vadd.f32 %v1393_v26, %v1385_v31 }
 0x2a9   : > { %1410 = vst.msk [vmem:[%s2541_s7 + $0x8] sm:$0xff] %vm1408_vm3, %v1401_v38  ;;  %v1361_v24 = vpop.permute.xlu1 %1360 }
 0x2aa   : > { %v1319_v60 = vpop.permute.xlu0 %1318  ;;  %v1384_v20 = vadd.f32 %v1361_v24, %v1334_v9  ;;  %v1375_v57 = vpop.permute.xlu2 %1374 }
 0x2ab   : > { %v1338_v18 = vadd.f32 %v1319_v60, %v1288_v1 }
 0x2ac   : > { %v1400_v28 = vadd.f32 %v1392_v6, %v1384_v20 }
 0x2ad   : > { %v1388_v44 = vadd.f32 %v1369_v32, %v1338_v18 }
 0x2ae   : > { %1409 = vst.msk [vmem:[%s2541_s7] sm:$0xff] %vm1408_vm3, %v1400_v28 }
 0x2af   : > { %v1404_v19 = vadd.f32 %v1396_v40, %v1388_v44 }
 0x2b1   : > { %1413 = vst.msk [vmem:[%s2541_s7 + $0x20] sm:$0xff] %vm1408_vm3, %v1404_v19  ;;  %v1367_v59 = vpop.permute.xlu1 %1366 }
 0x2b2   : > { %v1325_v4 = vpop.permute.xlu0 %1324  ;;  %v1387_v16 = vadd.f32 %v1367_v59, %v1337_v41 }
 0x2b3   : > { %v1341_v37 = vadd.f32 %v1325_v4, %v1291_v12 }
 0x2b4   : > { %v1403_v33 = vadd.f32 %v1395_v8, %v1387_v16 }
 0x2b5   : > { %v1391_v23 = vadd.f32 %v1375_v57, %v1341_v37 }
 0x2b6   : > { %1412 = vst.msk [vmem:[%s2541_s7 + $0x18] sm:$0xff] %vm1408_vm3, %v1403_v33 }
 0x2b7   : > { %v1407_v62 = vadd.f32 %v1399_v54, %v1391_v23 }
 0x2b9   : > { %1416 = vst.msk [vmem:[%s2541_s7 + $0x38] sm:$0xff] %vm1408_vm3, %v1407_v62  ;;  %v1373_v49 = vpop.permute.xlu1 %1372 }
 0x2ba   : > { %v1365_v45 = vpop.permute.xlu0 %1364  ;;  %v1390_v47 = vadd.f32 %v1373_v49, %v1340_v0 }
 0x2bb   : > { %v1386_v50 = vadd.f32 %v1365_v45, %v1336_v11 }
 0x2bc   : > { %v1406_v42 = vadd.f32 %v1398_v5, %v1390_v47 }
 0x2bd   : > { %v1402_v30 = vadd.f32 %v1394_v29, %v1386_v50 }
 0x2be   : > { %1415 = vst.msk [vmem:[%s2541_s7 + $0x30] sm:$0xff] %vm1408_vm3, %v1406_v42 }
 0x2bf   : > { %1411 = vst.msk [vmem:[%s2541_s7 + $0x10] sm:$0xff] %vm1408_vm3, %v1402_v30 }
 0x2c2   : > { %v1371_v2 = vpop.permute.xlu0 %1370 }
 0x2c3   : > { %v1389_v46 = vadd.f32 %v1371_v2, %v1339_v13 }
 0x2c5   : > { %v1405_v56 = vadd.f32 %v1397_v15, %v1389_v46 }
 0x2c7   : > { %1414 = vst.msk [vmem:[%s2541_s7 + $0x28] sm:$0xff] %vm1408_vm3, %v1405_v56 }
 0x2c8   : > { %1733 = shalt.err (!%p1730_p1)
}
 0x2c9   : > { %s1803_s17 = smov 128   ;;  %s1804_s26 = smov 8  }
 0x2ca   : > { %1584 = dma.vmem_to_hbm [thread:$0]  (%p1872_p8), %s1434_s8, 1024, %s1436_s16, %s1418_s12, %s1803_s17, %s1803_s17, %s1804_s26  }
 0x2cb PF: > { %s1450_s20 = sand.u32 1, %s1772_s9   ;;  %p1595_p2 = pnand %p1539_p13, %p1876_p9 }
 0x2cc   : > { %s1451_s5 = scalar_lea.sflag [#allocation5], %s1450_s20 }
 0x2cd   : > { %p1596_p4 = pneg %p1595_p2 }
 0x2cf   : > { %1767 = dma.done.wait (%p1596_p4), %s1451_s5, 1024  }
 0x2d0   : > { %1769 = vsyncadd (%p1596_p4), %s1451_s5, 4294966272  ;;  %s19_s14 = sadd.s32 1, %s1792_s14   ;;  %s2623_s9 = smov %s1776_s10 }
 0x2d1   : > { %p16_p6 = scmp.ge.s32.totalorder %s19_s14, 4   ;;  %s2624_s10 = smov %s1780_s11 }
 0x2d2   : > { %s2625_s11 = smov %s1914_s19  ;;  %s2626_s12 = smov %s1788_s13 }
 0x2d3   : > { %s2627_s13 = smov %s2629_s28  ;;  %18 = sbr.rel (!%p16_p6) target bundleno = 7 (0x7), region = 78 }
 0x2d8   :  { %1457 = vsyncpa [#allocation4], 1 }
 0x2d9   :  { %1459 = vsyncpa [#allocation4 + $0x1], 1 }
 0x2da   :  { %1460 = vsyncpa [#allocation5], 1 }
 0x2db   :  { %1462 = vsyncpa [#allocation5 + $0x1], 1 }
 0x2dc   :  { %1463 = vsyncpa [#allocation6], 1 }
 0x2dd   :  { %1465 = vsyncpa [#allocation6 + $0x1], 1 }

</bundles_post_ra>
